<compile_context>
chip_gen: v6e
topology: v6e:2x2x1
jax: 0.10.0
libtpu: 0.0.40
codegen_flags: <defaults>
</compile_context>

<pallas_src>
import functools

import jax
import jax.numpy as jnp
import numpy as np
from jax.experimental import pallas as pl
from jax.experimental.pallas import tpu as pltpu


# ---------------------------------------------------------------------------
# Pass 1: streaming k-softmax context accumulation over F tiles + w_ctx emit.
# ---------------------------------------------------------------------------
def _context_kernel(x_ref, w_kv_ref, w_out_ref, mask_ref, wctx_ref,
                    m_ref, l_ref, acc_ref):
    t = pl.program_id(1)

    @pl.when(t == 0)
    def _init():
        m_ref[...] = jnp.full(m_ref.shape, -jnp.inf, dtype=m_ref.dtype)
        l_ref[...] = jnp.zeros(l_ref.shape, dtype=l_ref.dtype)
        acc_ref[...] = jnp.zeros(acc_ref.shape, dtype=acc_ref.dtype)

    cdt = x_ref.dtype                                   # MXU compute dtype
    x = x_ref[...]                                      # (dim, Ft)

    # 1x1 Conv1d (no bias) for k and v only: (2*hidden, dim) @ (dim, Ft).
    kv = jax.lax.dot_general(w_kv_ref[...], x, (((1,), (0,)), ((), ())),
                             preferred_element_type=jnp.float32)
    hidden = kv.shape[0] // 2
    k = kv[:hidden, :]                                  # (hidden, Ft), f32
    v = kv[hidden:, :]                                  # (hidden, Ft), f32

    # Online softmax of k over the sequence axis (per channel row).
    m_tile = jnp.max(k, axis=1, keepdims=True)          # (hidden, 1)
    m_new = jnp.maximum(m_ref[...], m_tile)
    alpha = jnp.exp(m_ref[...] - m_new)                 # rescale of old stats
    p = jnp.exp(k - m_new)                              # un-normalized weights
    l_ref[...] = alpha * l_ref[...] + jnp.sum(p, axis=1, keepdims=True)

    # acc[d, e] += sum_n p[d, n] * v[e, n]  — contraction on the last dim of
    # both operands (native transposed-RHS MXU form, no transpose emitted).
    pv = jax.lax.dot_general(p.astype(cdt), v.astype(cdt),
                             (((1,), (1,)), ((), ())),
                             preferred_element_type=jnp.float32)
    acc_ref[...] = alpha * acc_ref[...] + pv
    m_ref[...] = m_new

    @pl.when(t == pl.num_programs(1) - 1)
    def _finalize():
        # Normalize the k-softmax, keep only per-head (block-diagonal) blocks;
        # mask_ref is the 0/scale constant, so `scale` is folded in here.
        inv_l = pl.reciprocal(l_ref[...], approx=False)   # cold path -> exact
        ctx = acc_ref[...] * inv_l * mask_ref[...]        # (hidden, hidden)
        # Reassociated projection weight:
        #   w_ctx[o, d] = sum_e w_out[o, e] * ctx[d, e]   (F-independent)
        wctx = jax.lax.dot_general(w_out_ref[...], ctx.astype(w_out_ref.dtype),
                                   (((1,), (1,)), ((), ())),
                                   preferred_element_type=jnp.float32)
        wctx_ref[...] = wctx.astype(wctx_ref.dtype)


# ---------------------------------------------------------------------------
# Pass 2: q-softmax, reassociated projection, bias, channel LayerNorm.
# ---------------------------------------------------------------------------
def _emit_kernel(x_ref, w_q_ref, wctx_ref, b_ref, g_ref, o_ref, *,
                 heads, dim_head, eps):
    cdt = x_ref.dtype
    x = x_ref[...]                                      # (dim, Ft)
    ft = x.shape[-1]
    hidden = heads * dim_head

    q = jax.lax.dot_general(w_q_ref[...], x, (((1,), (0,)), ((), ())),
                            preferred_element_type=jnp.float32)   # (hidden, Ft)

    # Softmax over each head's channel block ('b h c f', dim=-2); the sublane
    # split (hidden -> heads x dim_head) is tile-aligned (dim_head % 8 == 0).
    q3 = q.reshape(heads, dim_head, ft)
    q3 = q3 - jnp.max(q3, axis=1, keepdims=True)
    qe = jnp.exp(q3)
    # Hot per-tile denominator: approximate EUP reciprocal (review item).
    q_inv = pl.reciprocal(jnp.sum(qe, axis=1, keepdims=True), approx=True)
    q_sm = (qe * q_inv).reshape(hidden, ft).astype(cdt)
    # NOTE: `scale` is already folded into w_ctx (via the pre-scaled mask).

    # proj = (w_out @ ctx) @ q  — reassociated; (dim, hidden) x (hidden, Ft).
    proj = jax.lax.dot_general(wctx_ref[...], q_sm, (((1,), (0,)), ((), ())),
                               preferred_element_type=jnp.float32)
    proj = proj + b_ref[...].astype(jnp.float32)        # (dim, 1) broadcast

    # Channel-wise LayerNorm, fused statistics (single pass for sum & sum^2).
    # TODO(synk): the LayerNorm class body is not in the reference file; this
    # implements the standard conv-layout gamma-only LayerNorm (biased var,
    # eps inside rsqrt, no beta) that is usually paired with this module.
    dim = proj.shape[0]
    s1 = jnp.sum(proj, axis=0, keepdims=True)
    s2 = jnp.sum(proj * proj, axis=0, keepdims=True)
    mean = s1 * (1.0 / dim)
    var = jnp.maximum(s2 * (1.0 / dim) - mean * mean, 0.0)
    g = g_ref[...].astype(jnp.float32)
    o_ref[...] = ((proj - mean) * jax.lax.rsqrt(var + eps) * g).astype(o_ref.dtype)


# ---------------------------------------------------------------------------
# Wrapper
# ---------------------------------------------------------------------------
def _vmem_limit_bytes():
    """~80% of the chip's physical VMEM (fallback 64 MiB), capped at 100 MiB."""
    cap = 64 << 20
    try:
        info = pltpu.get_tpu_info()
        cap = int(getattr(info, "vmem_capacity_bytes", cap) or cap)
    except Exception:
        pass
    return int(min(cap * 0.8, 100 << 20))


def _pick_block_f(F, max_block_f):
    assert F % 128 == 0, "sequence length must be a multiple of 128"
    bf = min(F, max(128, (max_block_f // 128) * 128))
    while F % bf != 0:
        bf -= 128
    return bf


def linear_attention(x, w_qkv, w_out, b_out, g, *, heads, dim_head,
                     eps=1e-5, block_f=1024):
    B, dim, F = x.shape
    hidden = heads * dim_head
    assert w_qkv.shape == (3 * hidden, dim), w_qkv.shape
    assert w_out.shape == (dim, hidden), w_out.shape
    assert dim_head % 8 == 0 and dim % 8 == 0

    bf = _pick_block_f(F, block_f)
    nft = F // bf
    scale = dim_head ** (-0.5)
    vmem_limit = _vmem_limit_bytes()

    # Block-diagonal (per-head) context mask, pre-multiplied by `scale`:
    # replaces the per-step iota/where mask and the (hidden, F) q*scale pass.
    mask = jnp.asarray(
        np.kron(np.eye(heads, dtype=np.float32),
                np.ones((dim_head, dim_head), dtype=np.float32)) * scale)

    w_q = w_qkv[:hidden]                      # (hidden, dim)
    w_kv = w_qkv[hidden:]                     # (2*hidden, dim)
    # Accept raw PyTorch Conv1d bias / LayerNorm gamma of shape (dim,) too.
    b_out = jnp.asarray(b_out).reshape(dim, 1)
    g = jnp.asarray(g).reshape(dim, 1)

    # ---- pass 1: per-batch context -> reassociated projection weight -------
    w_ctx = pl.pallas_call(
        _context_kernel,
        out_shape=jax.ShapeDtypeStruct((B, dim, hidden), x.dtype),
        grid=(B, nft),
        in_specs=[
            pl.BlockSpec((None, dim, bf), lambda b, t: (b, 0, t)),    # x tile
            pl.BlockSpec((2 * hidden, dim), lambda b, t: (0, 0)),     # W_kv
            pl.BlockSpec((dim, hidden), lambda b, t: (0, 0)),         # W_out
            pl.BlockSpec((hidden, hidden), lambda b, t: (0, 0)),      # mask*scale
        ],
        out_specs=pl.BlockSpec((None, dim, hidden), lambda b, t: (b, 0, 0)),
        scratch_shapes=[
            pltpu.VMEM((hidden, 1), jnp.float32),        # running max (k rows)
            pltpu.VMEM((hidden, 1), jnp.float32),        # running sum (k rows)
            pltpu.VMEM((hidden, hidden), jnp.float32),   # context numerator
        ],
        compiler_params=pltpu.CompilerParams(
            dimension_semantics=("parallel", "arbitrary"),
            vmem_limit_bytes=vmem_limit),
    )(x, w_kv, w_out, mask)

    # ---- pass 2: q-softmax, projection, bias, LayerNorm (all F-tile local) --
    emit = functools.partial(_emit_kernel, heads=heads, dim_head=dim_head,
                             eps=eps)
    return pl.pallas_call(
        emit,
        out_shape=jax.ShapeDtypeStruct((B, dim, F), x.dtype),
        grid=(B, nft),
        in_specs=[
            pl.BlockSpec((None, dim, bf), lambda b, t: (b, 0, t)),      # x tile
            pl.BlockSpec((hidden, dim), lambda b, t: (0, 0)),           # W_q
            pl.BlockSpec((None, dim, hidden), lambda b, t: (b, 0, 0)),  # w_ctx
            pl.BlockSpec((dim, 1), lambda b, t: (0, 0)),                # bias
            pl.BlockSpec((dim, 1), lambda b, t: (0, 0)),                # gamma
        ],
        out_specs=pl.BlockSpec((None, dim, bf), lambda b, t: (b, 0, t)),
        compiler_params=pltpu.CompilerParams(
            dimension_semantics=("parallel", "parallel"),
            vmem_limit_bytes=vmem_limit),
    )(x, w_q, w_ctx, b_out, g)


# ---------------------------------------------------------------------------
# Pure-JAX reference mirroring the PyTorch forward.
# ---------------------------------------------------------------------------
def linear_attention_ref(x, w_qkv, w_out, b_out, g, *, heads, dim_head, eps=1e-5):
    B, dim, F = x.shape
    hidden = heads * dim_head
    scale = dim_head ** (-0.5)
    qkv = jnp.einsum('oc,bcf->bof', w_qkv, x)
    q, k, v = jnp.split(qkv, 3, axis=1)
    q, k, v = (t.reshape(B, heads, dim_head, F) for t in (q, k, v))
    q = jax.nn.softmax(q, axis=-2) * scale
    k = jax.nn.softmax(k, axis=-1)
    ctx = jnp.einsum('bhdn,bhen->bhde', k, v)
    out = jnp.einsum('bhde,bhdn->bhen', ctx, q).reshape(B, hidden, F)
    proj = (jnp.einsum('oc,bcf->bof', w_out, out)
            + jnp.asarray(b_out).reshape(1, dim, 1))
    mean = jnp.mean(proj, axis=1, keepdims=True)
    var = jnp.mean((proj - mean) ** 2, axis=1, keepdims=True)
    return (proj - mean) * jax.lax.rsqrt(var + eps) * jnp.asarray(g).reshape(1, dim, 1)


if __name__ == "__main__":
    # Module defaults heads=4, dim_head=32 -> hidden=128.  F=512 with
    # block_f=128 exercises the F-tiled two-pass path (4 sequence tiles).
    B, dim, F = 2, 32, 512
    heads, dim_head = 4, 32
    hidden = heads * dim_head

    key = jax.random.PRNGKey(0)
    k0, k1, k2, k3, k4 = jax.random.split(key, 5)
    x = jax.random.normal(k0, (B, dim, F), dtype=jnp.float32)
    w_qkv = jax.random.normal(k1, (3 * hidden, dim), dtype=jnp.float32) * 0.1
    w_out = jax.random.normal(k2, (dim, hidden), dtype=jnp.float32) * 0.1
    b_out = jax.random.normal(k3, (dim,), dtype=jnp.float32) * 0.1   # Conv1d bias
    g = 1.0 + 0.1 * jax.random.normal(k4, (dim,), dtype=jnp.float32)  # LN gamma

    out = linear_attention(x, w_qkv, w_out, b_out, g,
                           heads=heads, dim_head=dim_head, block_f=128)
    out = jax.block_until_ready(out)
    assert out.shape == (B, dim, F)

    ref = linear_attention_ref(x, w_qkv, w_out, b_out, g,
                               heads=heads, dim_head=dim_head)
    # Tolerance covers MXU default-precision, the reassociated contraction
    # order, and the approximate EUP reciprocal in the q-softmax (~1e-3 rel).
    assert jnp.allclose(out, ref, atol=5e-3, rtol=5e-3), "f32 mismatch vs reference"

    # bf16 production path (previously untested): same quantized inputs, f32
    # reference math; tolerance sized for bf16 MXU operands / intermediates.
    xb, wqb, wob = (t.astype(jnp.bfloat16) for t in (x, w_qkv, w_out))
    bob, gb = b_out.astype(jnp.bfloat16), g.astype(jnp.bfloat16)
    out_bf = linear_attention(xb, wqb, wob, bob, gb,
                              heads=heads, dim_head=dim_head, block_f=128)
    out_bf = jax.block_until_ready(out_bf).astype(jnp.float32)
    ref_bf = linear_attention_ref(
        xb.astype(jnp.float32), wqb.astype(jnp.float32), wob.astype(jnp.float32),
        bob.astype(jnp.float32), gb.astype(jnp.float32),
        heads=heads, dim_head=dim_head)
    assert jnp.allclose(out_bf, ref_bf, atol=5e-2, rtol=5e-2), "bf16 mismatch vs reference"

    print("KERNEL_OK")
</pallas_src>

<mosaic_0001>
module attributes {stable_mosaic.version = 11 : i64} {
  func.func @_context_kernel(%arg0: i32, %arg1: i32, %arg2: memref<1x32x128xf32, #tpu.memory_space<vmem>>, %arg3: memref<256x32xf32, #tpu.memory_space<vmem>>, %arg4: memref<32x128xf32, #tpu.memory_space<vmem>>, %arg5: memref<128x128xf32, #tpu.memory_space<vmem>>, %arg6: memref<1x32x128xf32, #tpu.memory_space<vmem>>, %arg7: memref<128x1xf32, #tpu.memory_space<vmem>>, %arg8: memref<128x1xf32, #tpu.memory_space<vmem>>, %arg9: memref<128x128xf32, #tpu.memory_space<vmem>>) attributes {dimension_semantics = [#tpu.dimension_semantics<parallel>, #tpu.dimension_semantics<arbitrary>], iteration_bounds = array<i64: 2, 4>, scalar_prefetch = 0 : i64, scratch_operands = 3 : i64, tpu.core_type = #tpu.core_type<tc>, window_params = [{transform_indices = @transform_0, window_bounds = array<i64: 1, 32, 128>}, {pipeline_mode = #tpu.pipeline_mode<synchronous>, transform_indices = @transform_1, window_bounds = array<i64: 256, 32>}, {pipeline_mode = #tpu.pipeline_mode<synchronous>, transform_indices = @transform_2, window_bounds = array<i64: 32, 128>}, {pipeline_mode = #tpu.pipeline_mode<synchronous>, transform_indices = @transform_3, window_bounds = array<i64: 128, 128>}, {transform_indices = @transform_4, window_bounds = array<i64: 1, 32, 128>}]} {
    %c0_i32 = arith.constant 0 : i32
    %0 = arith.cmpi eq, %arg1, %c0_i32 : i32
    %1 = arith.extui %0 : i1 to i32
    %c0_i32_0 = arith.constant 0 : i32
    %2 = arith.cmpi ne, %1, %c0_i32_0 : i32
    scf.if %2 {
      %cst_23 = arith.constant 0xFF800000 : f32
      %35 = vector.broadcast %cst_23 : f32 to vector<128x1xf32>
      %c0_24 = arith.constant 0 : index
      %c0_25 = arith.constant 0 : index
      %36 = vector.load %arg7[%c0_24, %c0_25] : memref<128x1xf32, #tpu.memory_space<vmem>>, vector<128x1xf32>
      tpu.vector_store %arg7[%c0_24, %c0_25], %35 {strides = array<i32>} : memref<128x1xf32, #tpu.memory_space<vmem>>, vector<128x1xf32>,
      %cst_26 = arith.constant 0.000000e+00 : f32
      %37 = vector.broadcast %cst_26 : f32 to vector<128x1xf32>
      %c0_27 = arith.constant 0 : index
      %c0_28 = arith.constant 0 : index
      %38 = vector.load %arg8[%c0_27, %c0_28] : memref<128x1xf32, #tpu.memory_space<vmem>>, vector<128x1xf32>
      tpu.vector_store %arg8[%c0_27, %c0_28], %37 {strides = array<i32>} : memref<128x1xf32, #tpu.memory_space<vmem>>, vector<128x1xf32>,
      %cst_29 = arith.constant 0.000000e+00 : f32
      %39 = vector.broadcast %cst_29 : f32 to vector<128x128xf32>
      %c0_30 = arith.constant 0 : index
      %c0_31 = arith.constant 0 : index
      %40 = vector.load %arg9[%c0_30, %c0_31] : memref<128x128xf32, #tpu.memory_space<vmem>>, vector<128x128xf32>
      tpu.vector_store %arg9[%c0_30, %c0_31], %39 {strides = array<i32>} : memref<128x128xf32, #tpu.memory_space<vmem>>, vector<128x128xf32>,
    } else {
    }
    %c0 = arith.constant 0 : index
    %c0_1 = arith.constant 0 : index
    %c0_2 = arith.constant 0 : index
    %3 = vector.load %arg2[%c0, %c0_1, %c0_2] : memref<1x32x128xf32, #tpu.memory_space<vmem>>, vector<1x32x128xf32>
    %4 = vector.shape_cast %3 : vector<1x32x128xf32> to vector<32x128xf32>
    %c0_3 = arith.constant 0 : index
    %c0_4 = arith.constant 0 : index
    %5 = vector.load %arg3[%c0_3, %c0_4] : memref<256x32xf32, #tpu.memory_space<vmem>>, vector<256x32xf32>
    %cst = arith.constant dense<0.000000e+00> : vector<256x128xf32>
    %6 = tpu.matmul %5, %4, %cst {dimension_numbers = #tpu.dot_dimension_numbers<[1], [0], [0], [1], [0, 0, 1, 1], [], []>} : vector<256x32xf32>, vector<32x128xf32>, vector<256x128xf32> -> vector<256x128xf32>
    %7 = vector.extract_strided_slice %6 {offsets = [0, 0], sizes = [128, 128], strides = [1, 1]} : vector<256x128xf32> to vector<128x128xf32>
    %8 = vector.extract_strided_slice %6 {offsets = [128, 0], sizes = [128, 128], strides = [1, 1]} : vector<256x128xf32> to vector<128x128xf32>
    %cst_5 = arith.constant dense<0xFF800000> : vector<128xf32>
    %9 = vector.multi_reduction <maximumf>, %7, %cst_5 [1] : vector<128x128xf32> to vector<128xf32>
    %10 = vector.shape_cast %9 : vector<128xf32> to vector<128x1xf32>
    %c0_6 = arith.constant 0 : index
    %c0_7 = arith.constant 0 : index
    %11 = vector.load %arg7[%c0_6, %c0_7] : memref<128x1xf32, #tpu.memory_space<vmem>>, vector<128x1xf32>
    %12 = arith.maximumf %11, %10 : vector<128x1xf32>
    %c0_8 = arith.constant 0 : index
    %c0_9 = arith.constant 0 : index
    %13 = vector.load %arg7[%c0_8, %c0_9] : memref<128x1xf32, #tpu.memory_space<vmem>>, vector<128x1xf32>
    %14 = arith.subf %13, %12 : vector<128x1xf32>
    %15 = math.exp %14 : vector<128x1xf32>
    %16 = vector.broadcast %12 : vector<128x1xf32> to vector<128x128xf32>
    %17 = arith.subf %7, %16 : vector<128x128xf32>
    %18 = math.exp %17 : vector<128x128xf32>
    %c0_10 = arith.constant 0 : index
    %c0_11 = arith.constant 0 : index
    %19 = vector.load %arg8[%c0_10, %c0_11] : memref<128x1xf32, #tpu.memory_space<vmem>>, vector<128x1xf32>
    %20 = arith.mulf %15, %19 : vector<128x1xf32>
    %cst_12 = arith.constant dense<0.000000e+00> : vector<128xf32>
    %21 = vector.multi_reduction <add>, %18, %cst_12 [1] : vector<128x128xf32> to vector<128xf32>
    %22 = vector.shape_cast %21 : vector<128xf32> to vector<128x1xf32>
    %23 = arith.addf %20, %22 : vector<128x1xf32>
    %c0_13 = arith.constant 0 : index
    %c0_14 = arith.constant 0 : index
    %24 = vector.load %arg8[%c0_13, %c0_14] : memref<128x1xf32, #tpu.memory_space<vmem>>, vector<128x1xf32>
    tpu.vector_store %arg8[%c0_13, %c0_14], %23 {strides = array<i32>} : memref<128x1xf32, #tpu.memory_space<vmem>>, vector<128x1xf32>,
    %cst_15 = arith.constant dense<0.000000e+00> : vector<128x128xf32>
    %25 = tpu.matmul %18, %8, %cst_15 {dimension_numbers = #tpu.dot_dimension_numbers<[1], [1], [0], [0], [0, 0, 1, 0], [], []>} : vector<128x128xf32>, vector<128x128xf32>, vector<128x128xf32> -> vector<128x128xf32>
    %c0_16 = arith.constant 0 : index
    %c0_17 = arith.constant 0 : index
    %26 = vector.load %arg9[%c0_16, %c0_17] : memref<128x128xf32, #tpu.memory_space<vmem>>, vector<128x128xf32>
    %27 = vector.broadcast %15 : vector<128x1xf32> to vector<128x128xf32>
    %28 = arith.mulf %27, %26 : vector<128x128xf32>
    %29 = arith.addf %28, %25 : vector<128x128xf32>
    %c0_18 = arith.constant 0 : index
    %c0_19 = arith.constant 0 : index
    %30 = vector.load %arg9[%c0_18, %c0_19] : memref<128x128xf32, #tpu.memory_space<vmem>>, vector<128x128xf32>
    tpu.vector_store %arg9[%c0_18, %c0_19], %29 {strides = array<i32>} : memref<128x128xf32, #tpu.memory_space<vmem>>, vector<128x128xf32>,
    %c0_20 = arith.constant 0 : index
    %c0_21 = arith.constant 0 : index
    %31 = vector.load %arg7[%c0_20, %c0_21] : memref<128x1xf32, #tpu.memory_space<vmem>>, vector<128x1xf32>
    tpu.vector_store %arg7[%c0_20, %c0_21], %12 {strides = array<i32>} : memref<128x1xf32, #tpu.memory_space<vmem>>, vector<128x1xf32>,
    %c3_i32 = arith.constant 3 : i32
    %32 = arith.cmpi eq, %arg1, %c3_i32 : i32
    %33 = arith.extui %32 : i1 to i32
    %c0_i32_22 = arith.constant 0 : i32
    %34 = arith.cmpi ne, %33, %c0_i32_22 : i32
    scf.if %34 {
      %c0_23 = arith.constant 0 : index
      %c0_24 = arith.constant 0 : index
      %35 = vector.load %arg8[%c0_23, %c0_24] : memref<128x1xf32, #tpu.memory_space<vmem>>, vector<128x1xf32>
      %36 = tpu.reciprocal %35 : vector<128x1xf32> -> vector<128x1xf32>
      %c0_25 = arith.constant 0 : index
      %c0_26 = arith.constant 0 : index
      %37 = vector.load %arg9[%c0_25, %c0_26] : memref<128x128xf32, #tpu.memory_space<vmem>>, vector<128x128xf32>
      %38 = vector.broadcast %36 : vector<128x1xf32> to vector<128x128xf32>
      %39 = arith.mulf %37, %38 : vector<128x128xf32>
      %c0_27 = arith.constant 0 : index
      %c0_28 = arith.constant 0 : index
      %40 = vector.load %arg5[%c0_27, %c0_28] : memref<128x128xf32, #tpu.memory_space<vmem>>, vector<128x128xf32>
      %41 = arith.mulf %39, %40 : vector<128x128xf32>
      %c0_29 = arith.constant 0 : index
      %c0_30 = arith.constant 0 : index
      %42 = vector.load %arg4[%c0_29, %c0_30] : memref<32x128xf32, #tpu.memory_space<vmem>>, vector<32x128xf32>
      %cst_31 = arith.constant dense<0.000000e+00> : vector<32x128xf32>
      %43 = tpu.matmul %42, %41, %cst_31 {dimension_numbers = #tpu.dot_dimension_numbers<[1], [1], [0], [0], [0, 0, 1, 0], [], []>} : vector<32x128xf32>, vector<128x128xf32>, vector<32x128xf32> -> vector<32x128xf32>
      %c0_32 = arith.constant 0 : index
      %c0_33 = arith.constant 0 : index
      %c0_34 = arith.constant 0 : index
      %44 = vector.load %arg6[%c0_32, %c0_33, %c0_34] : memref<1x32x128xf32, #tpu.memory_space<vmem>>, vector<1x32x128xf32>
      %45 = vector.shape_cast %44 : vector<1x32x128xf32> to vector<32x128xf32>
      %46 = vector.shape_cast %43 : vector<32x128xf32> to vector<1x32x128xf32>
      tpu.vector_store %arg6[%c0_32, %c0_33, %c0_34], %46 {strides = array<i32>} : memref<1x32x128xf32, #tpu.memory_space<vmem>>, vector<1x32x128xf32>,
    } else {
    }
    return
  }
  func.func @transform_0(%arg0: i32, %arg1: i32) -> (i32, i32, i32) {
    %c0_i32 = arith.constant 0 : i32
    %c0_i32_0 = arith.constant 0 : i32
    return %arg0, %c0_i32, %arg1 : i32, i32, i32
  }
  func.func @transform_1(%arg0: i32, %arg1: i32) -> (i32, i32) {
    %c0_i32 = arith.constant 0 : i32
    %c0_i32_0 = arith.constant 0 : i32
    %c0_i32_1 = arith.constant 0 : i32
    return %c0_i32, %c0_i32_0 : i32, i32
  }
  func.func @transform_2(%arg0: i32, %arg1: i32) -> (i32, i32) {
    %c0_i32 = arith.constant 0 : i32
    %c0_i32_0 = arith.constant 0 : i32
    %c0_i32_1 = arith.constant 0 : i32
    return %c0_i32, %c0_i32_0 : i32, i32
  }
  func.func @transform_3(%arg0: i32, %arg1: i32) -> (i32, i32) {
    %c0_i32 = arith.constant 0 : i32
    %c0_i32_0 = arith.constant 0 : i32
    %c0_i32_1 = arith.constant 0 : i32
    return %c0_i32, %c0_i32_0 : i32, i32
  }
  func.func @transform_4(%arg0: i32, %arg1: i32) -> (i32, i32, i32) {
    %c0_i32 = arith.constant 0 : i32
    %c0_i32_0 = arith.constant 0 : i32
    %c0_i32_1 = arith.constant 0 : i32
    return %arg0, %c0_i32, %c0_i32_0 : i32, i32, i32
  }
}

</mosaic_0001>

<bundles_post_ra>
// kernel: tpu_custom_call.1
= control target key start
LH: loop header
LB: loop body
LE: loop exit
PB: predicated region body
PF: predicated region fallthrough
CT: control target
= control target key end

     0   :  { %9 = vsyncpa [#allocation7], 0  ;;  %s3156_s0 = inlined_call_operand.vmem [shape: f32[2,32,512], index: 0, kind: input, shape index: {}]   ;;  %s3157_s1 = inlined_call_operand.vmem [shape: f32[256,32], index: 1, kind: input, shape index: {}]   ;;  %s3158_s2 = inlined_call_operand.vmem [shape: f32[32,128], index: 2, kind: input, shape index: {}]   ;;  %s3159_s3 = inlined_call_operand.hbm [shape: f32[128,128], index: 3, kind: input, shape index: {}]   ;;  %s3160_s4 = inlined_call_operand.hbm [shape: f32[2,32,128], index: 4, kind: output, shape index: {}]  }
   0x1   :  { %10 = vsyncpa [#allocation8], 0 }
   0x2   :  { %12 = vsyncpa [#allocation8 + $0x1], 0  ;;  %s2442_s15 = smov 0   ;;  %s2444_s16 = smov 0  }
   0x3   :  { %s2446_s17 = smov 0   ;;  %s2448_s18 = smov 0  }
   0x4   :  { %s2450_s19 = smov 0   ;;  %s2452_s20 = smov 0  }
   0x5   :  { %s2454_s21 = smov 0   ;;  %s2456_s22 = smov 0  }
   0x6   :  { %s2458_s23 = smov 0   ;;  %s2460_s24 = smov 0  }
   0x7 LB: > { %3166 = sst [smem:[#allocation12_spill]] %s2377_s17  ;;  %s1707_s25 = sadd.s32 4294967295, %s2405_s24   ;;  %s2405_s24 = sphi %s2460_s24, %s18_s24   ;;  %s2401_s23 = sphi %s2458_s23, %s3193_s23   ;;  %s2397_s22 = sphi %s2456_s22, %s3192_s22   ;;  %s2393_s21 = sphi %s2454_s21, %s3191_s21   ;;  %s2389_s20 = sphi %s2452_s20, %s3190_s20   ;;  %s2385_s19 = sphi %s2450_s19, %s3189_s19   ;;  %s2381_s18 = sphi %s2448_s18, %s3188_s18   ;;  %s2377_s17 = sphi %s2446_s17, %s3187_s17   ;;  %s2373_s16 = sphi %s2444_s16, %s3186_s16   ;;  %s2369_s15 = sphi %s2442_s15, %s3185_s15  }
   0x8   : > { %s1708_s26 = sadd.s32 4294967294, %s2405_s24   ;;  %s27_s27 = sadd.s32 1, %s2397_s22 }
   0x9   : > { %s30_s28 = sadd.s32 1, %s2401_s23  ;;  %p28_p0 = scmp.ge.s32.totalorder %s27_s27, 4 }
   0xa   : > { %s39_s29 = sadd.s32 1, %s2385_s19  ;;  %p46_p1 = scmp.ne.s32.totalorder %s2385_s19, %s2381_s18 }
   0xb   : > { %p47_p2 = scmp.eq.s32.totalorder %s2405_s24, 0  ;;  %s3195_s27 = smov (%p28_p0, %s27_s27), 0 }
   0xc   : > { %3167 = sst [smem:[#allocation13_spill]] %s3195_s27  ;;  %s3197_s28 = smov (!%p28_p0, %s30_s28), %s2401_s23 }
   0xd   : > { %s35_s30 = ssub.s32 %s2397_s22, %s3195_s27  ;;  %p2505_p3 = por %p47_p2, %p46_p1 }
   0xe   : > { %p32_p4 = scmp.ge.s32.totalorder %s3197_s28, 2  ;;  %s128_s6 = sadd.s32 1, %s2377_s17 }
   0xf   : > { %p138_p5 = scmp.ne.s32.totalorder %s2377_s17, %s2373_s16  ;;  %p139_p6 = scmp.eq.s32.totalorder %s1707_s25, 7 }
  0x10   : > { %s3199_s28 = smov (%p32_p4, %s3197_s28), 0  ;;  %p144_p8 = scmp.ne.s32.totalorder %s2373_s16, %s2369_s15 }
  0x11   : > { %3169 = sst [smem:[#allocation14_spill]] %s3199_s28  ;;  %p2514_p7 = por %p139_p6, %p138_p5 }
  0x12   : > { %s34_s8 = ssub.s32 %s2401_s23, %s3199_s28  ;;  %p145_p9 = scmp.eq.s32.totalorder %s1708_s26, 7 }
  0x13   : > { %s3170_s7 = scalar_select %p2514_p7, 1, 0 }
  0x14   : > { %s36_s9 = sor.u32 %s35_s30, %s34_s8  ;;  %p126_p10 = scmp.eq.s32.totalorder %s34_s8, 0 }
  0x15   : > { %p37_p11 = scmp.eq.s32.totalorder %s36_s9, 0  ;;  %p2522_p12 = por %p145_p9, %p144_p8 }
  0x16   : > { %s2527_s11 = scalar_select %p126_p10, %s2377_s17, %s128_s6  }
  0x17   : > { %s3171_s10 = scalar_select %p2522_p12, 1, 0 }
  0x18   : > { %3173 = sst [smem:[#allocation16_spill]] %s2527_s11  ;;  %p1709_p13 = scmp.ge.s32.totalorder %s2405_s24, 1 }
  0x19   : > { %3172 = sst [smem:[#allocation15_spill]] %s3171_s10  ;;  %p152_p0 = scmp.lt.s32.totalorder %s2405_s24, 9 }
  0x1a   : > { %s2530_s12 = scalar_select %p37_p11, %s2385_s19, %s39_s29  }
  0x1b   : > { %p2534_p1 = scmp.eq.s32.totalorder %s1707_s25, 0  ;;  %p2538_p2 = pnand %p1709_p13, %p152_p0 }
  0x1c   : > { %3174 = sst [smem:[#allocation17_spill]] %s2530_s12  ;;  %s2407_s26 = smov [#allocation6]  }
  0x1d   : > { %s170_s30 = sshll.u32 %s2407_s26, 4  ;;  %p2067_p4 = pneg %p2538_p2  ;;  %s171_s30 = int_to_ptr.vmem [resolvable:$true] %s170_s30 }
  0x1e   : > { %s2278_s29 = scalar_lea.vmem %s171_s30, 2048  ;;  %p2286_p11 = scmp.lt.s32.totalorder %s171_s30, %s171_s30 }
  0x1f   : > { %p2068_p5 = pnand %p2534_p1, %p2067_p4  ;;  %p2279_p8 = scmp.ne.s32.totalorder %s171_s30, %s2278_s29 }
  0x20   : > { %p2287_p12 = scmp.lt.s32.totalorder %s2278_s29, %s2278_s29 }
  0x21   : > { %p2269_p6 = pneg %p2068_p5 }
  0x22   : > { %p2288_p7 = por %p2287_p12, %p2286_p11 }
  0x23   : > { %p2281_p9 = pnand %p2279_p8, %p2269_p6 }
  0x25   : > { %p2282_p10 = pneg %p2281_p9 }
  0x27   : > { %p2289_p13 = pnand %p2288_p7, %p2282_p10 }
  0x29   : > { %2292 = shalt.err (!%p2289_p13)
}
  0x2a   : > { %s2408_s25 = smov 128   ;;  %s2409_s6 = smov 8  }
  0x2b   : > { %2070 = dma.hbm_to_vmem [thread:$0]  (!%p2068_p5), %s3159_s3, 2048, %s171_s30, [#allocation7], %s2408_s25, %s2408_s25, %s2409_s6  }
  0x2c   : > { %p1711_p0 = scmp.ge.s32.totalorder %s2405_s24, 8 }
  0x2e   : > { %180 = sbr.rel (%p1711_p0) target bundleno = 61 (0x3d), region = 28 }
  0x33   : > { %183 = sbr.rel (!%p2505_p3) target bundleno = 61 (0x3d), region = 32  ;;  %s185_s26 = sand.u32 (%p2505_p3), 1, %s2385_s19  }
  0x34   : > { %s1713_s29 = sshll.u32 (%p2505_p3), %s2401_s23, 4  ;;  %s1712_s28 = sshll.u32 (%p2505_p3), %s185_s26, 5 }
  0x35   : > { %s189_s27 = sadd.s32 (%p2505_p3), %s2397_s22, %s1713_s29  ;;  %s187_s30 = scalar_lea.vmem (%p2505_p3), [#allocation5], %s1712_s28 }
  0x36   : > { %s1714_s12 = sshll.u32 (%p2505_p3), %s189_s27, 3 }
  0x37   : > { %s191_s10 = scalar_lea.vmem (%p2505_p3), %s3156_s0, %s1714_s12 }
  0x38   : > { %v226_v0 = vld [vmem:[%s191_s10] sm:$0xff] }
  0x39   : > { %v228_v1 = vld [vmem:[%s191_s10 + $0x20] sm:$0xff]  ;;  %227 = vst [vmem:[%s187_s30] sm:$0xff] %v226_v0 }
  0x3a   : > { %v230_v2 = vld [vmem:[%s191_s10 + $0x40] sm:$0xff]  ;;  %229 = vst [vmem:[%s187_s30 + $0x8] sm:$0xff] %v228_v1 }
  0x3b   : > { %231 = vst [vmem:[%s187_s30 + $0x10] sm:$0xff] %v230_v2  ;;  %v232_v3 = vld [vmem:[%s191_s10 + $0x60] sm:$0xff] }
  0x3c   : > { %233 = vst [vmem:[%s187_s30 + $0x18] sm:$0xff] %v232_v3 }
  0x3d PF: > { %242 = sbr.rel (%p2538_p2) target bundleno = 1262 (0x4ee), region = 70  ;;  %s245_s27 = sand.u32 (!%p2538_p2), 1, %s2381_s18  }
  0x3e   : > { %s1716_s5 = sshll.u32 (!%p2538_p2), %s245_s27, 5 }
  0x3f   : > { %s2561_s17 = scalar_lea.vmem (!%p2538_p2), [#allocation5], %s1716_s5 }
  0x42   : > { %2360 = dma.done.wait (%p2534_p1), [#allocation7], 2048  }
  0x43   : > { %2362 = vsyncadd (%p2534_p1), [#allocation7], 4294965248  ;;  %s271_s28 = sand.u32 1, %s2373_s16   ;;  %p1719_p3 = scmp.ne.s32.totalorder %s2389_s20, 0 }
  0x44   : > { %s1718_s10 = sshll.u32 %s271_s28, 5 }
  0x45   : > { %s2570_s11 = scalar_lea.vmem [#allocation9], %s1718_s10  ;;  %277 = sbr.rel (%p1719_p3) target bundleno = 99 (0x63), region = 82 }
  0x4a   : > { %vm278_vm0 = vcmask 7168   ;;  %v2410_v4 = vmov -inf   ;;  %v2411_v5 = vmov 0.0  }
  0x4b   : > { %279 = vst.msk [vmem:[#allocation2] sm:$0xff] %vm278_vm0, %v2410_v4  ;;  %280 = vst.msk [vmem:[#allocation2 + $0x8] sm:$0xff] %vm278_vm0, %v2410_v4 }
  0x4c   : > { %281 = vst.msk [vmem:[#allocation2 + $0x10] sm:$0xff] %vm278_vm0, %v2410_v4  ;;  %282 = vst.msk [vmem:[#allocation2 + $0x18] sm:$0xff] %vm278_vm0, %v2410_v4 }
  0x4d   : > { %283 = vst.msk [vmem:[#allocation2 + $0x20] sm:$0xff] %vm278_vm0, %v2410_v4  ;;  %284 = vst.msk [vmem:[#allocation2 + $0x28] sm:$0xff] %vm278_vm0, %v2410_v4 }
  0x4e   : > { %285 = vst.msk [vmem:[#allocation2 + $0x30] sm:$0xff] %vm278_vm0, %v2410_v4  ;;  %286 = vst.msk [vmem:[#allocation2 + $0x38] sm:$0xff] %vm278_vm0, %v2410_v4 }
  0x4f   : > { %287 = vst.msk [vmem:[#allocation2 + $0x40] sm:$0xff] %vm278_vm0, %v2410_v4  ;;  %288 = vst.msk [vmem:[#allocation2 + $0x48] sm:$0xff] %vm278_vm0, %v2410_v4 }
  0x50   : > { %289 = vst.msk [vmem:[#allocation2 + $0x50] sm:$0xff] %vm278_vm0, %v2410_v4  ;;  %290 = vst.msk [vmem:[#allocation2 + $0x58] sm:$0xff] %vm278_vm0, %v2410_v4 }
  0x51   : > { %291 = vst.msk [vmem:[#allocation2 + $0x60] sm:$0xff] %vm278_vm0, %v2410_v4  ;;  %292 = vst.msk [vmem:[#allocation2 + $0x68] sm:$0xff] %vm278_vm0, %v2410_v4 }
  0x52   : > { %293 = vst.msk [vmem:[#allocation2 + $0x70] sm:$0xff] %vm278_vm0, %v2410_v4  ;;  %294 = vst.msk [vmem:[#allocation2 + $0x78] sm:$0xff] %vm278_vm0, %v2410_v4 }
  0x53   : > { %295 = vst.msk [vmem:[#allocation3] sm:$0xff] %vm278_vm0, %v2411_v5  ;;  %296 = vst.msk [vmem:[#allocation3 + $0x8] sm:$0xff] %vm278_vm0, %v2411_v5 }
  0x54   : > { %297 = vst.msk [vmem:[#allocation3 + $0x10] sm:$0xff] %vm278_vm0, %v2411_v5  ;;  %298 = vst.msk [vmem:[#allocation3 + $0x18] sm:$0xff] %vm278_vm0, %v2411_v5 }
  0x55   : > { %299 = vst.msk [vmem:[#allocation3 + $0x20] sm:$0xff] %vm278_vm0, %v2411_v5  ;;  %300 = vst.msk [vmem:[#allocation3 + $0x28] sm:$0xff] %vm278_vm0, %v2411_v5 }
  0x56   : > { %301 = vst.msk [vmem:[#allocation3 + $0x30] sm:$0xff] %vm278_vm0, %v2411_v5  ;;  %302 = vst.msk [vmem:[#allocation3 + $0x38] sm:$0xff] %vm278_vm0, %v2411_v5 }
  0x57   : > { %303 = vst.msk [vmem:[#allocation3 + $0x40] sm:$0xff] %vm278_vm0, %v2411_v5  ;;  %304 = vst.msk [vmem:[#allocation3 + $0x48] sm:$0xff] %vm278_vm0, %v2411_v5 }
  0x58   : > { %305 = vst.msk [vmem:[#allocation3 + $0x50] sm:$0xff] %vm278_vm0, %v2411_v5  ;;  %306 = vst.msk [vmem:[#allocation3 + $0x58] sm:$0xff] %vm278_vm0, %v2411_v5 }
  0x59   : > { %307 = vst.msk [vmem:[#allocation3 + $0x60] sm:$0xff] %vm278_vm0, %v2411_v5  ;;  %308 = vst.msk [vmem:[#allocation3 + $0x68] sm:$0xff] %vm278_vm0, %v2411_v5 }
  0x5a   : > { %309 = vst.msk [vmem:[#allocation3 + $0x70] sm:$0xff] %vm278_vm0, %v2411_v5  ;;  %310 = vst.msk [vmem:[#allocation3 + $0x78] sm:$0xff] %vm278_vm0, %v2411_v5 }
  0x5b   : > { %311 = vst [vmem:[#allocation4 + $0x30] sm:$0xff] %v2411_v5  ;;  %312 = vst [vmem:[#allocation4] sm:$0xff] %v2411_v5 }
  0x5c   : > { %313 = vst [vmem:[#allocation4 + $0x58] sm:$0xff] %v2411_v5  ;;  %314 = vst [vmem:[#allocation4 + $0x18] sm:$0xff] %v2411_v5 }
  0x5d   : > { %315 = vst [vmem:[#allocation4 + $0x50] sm:$0xff] %v2411_v5  ;;  %316 = vst [vmem:[#allocation4 + $0x68] sm:$0xff] %v2411_v5 }
  0x5e   : > { %317 = vst [vmem:[#allocation4 + $0x8] sm:$0xff] %v2411_v5  ;;  %318 = vst [vmem:[#allocation4 + $0x48] sm:$0xff] %v2411_v5 }
  0x5f   : > { %319 = vst [vmem:[#allocation4 + $0x40] sm:$0xff] %v2411_v5  ;;  %320 = vst [vmem:[#allocation4 + $0x20] sm:$0xff] %v2411_v5 }
  0x60   : > { %321 = vst [vmem:[#allocation4 + $0x10] sm:$0xff] %v2411_v5  ;;  %322 = vst [vmem:[#allocation4 + $0x38] sm:$0xff] %v2411_v5 }
  0x61   : > { %323 = vst [vmem:[#allocation4 + $0x60] sm:$0xff] %v2411_v5  ;;  %324 = vst [vmem:[#allocation4 + $0x70] sm:$0xff] %v2411_v5 }
  0x62   : > { %325 = vst [vmem:[#allocation4 + $0x78] sm:$0xff] %v2411_v5  ;;  %326 = vst [vmem:[#allocation4 + $0x28] sm:$0xff] %v2411_v5 }
  0x63 PF: > { %v330_v6 = vld [vmem:[%s2561_s17 + $0x18] sm:$0xff]  ;;  %v329_v7 = vld [vmem:[%s2561_s17 + $0x10] sm:$0xff]  ;;  %vm363_vm1 = vcmask 261120   ;;  %v331_v8 = vld [vmem:[%s3157_s1] sm:$0xff]  ;;  %v2412_v55 = vmov 0   ;;  %vm1005_vm2 = vcmask 7168  }
  0x64   : > { %1847 = vmatprep.subr.mxu0 %v330_v6  ;;  %v328_v9 = vld [vmem:[%s2561_s17 + $0x8] sm:$0xff]  ;;  %1855 = vmatprep.mubr.msk.f32.mxu0 %vm363_vm1, %v331_v8  ;;  %v327_v10 = vld [vmem:[%s2561_s17] sm:$0xff]  ;;  %v333_v12 = vld [vmem:[%s3157_s1 + $0x10] sm:$0xff]  ;;  %p1752_p7 = scmp.ne.s32.totalorder %s2389_s20, 3 }
  0x65   : > { %1848 = vmatpush3.msra.mxu0 %v330_v6  ;;  %v332_v11 = vld [vmem:[%s3157_s1 + $0x8] sm:$0xff]  ;;  %v334_v13 = vld [vmem:[%s3157_s1 + $0x18] sm:$0xff]  ;;  %v335_v14 = vld [vmem:[%s3157_s1 + $0x20] sm:$0xff]  ;;  %2168 = vset.pattern.permute.xlu1 %v2412_v55 }
  0x66   : > { %1849 = vmatprep.subr.mxu0 %v329_v7  ;;  %v336_v15 = vld [vmem:[%s3157_s1 + $0x28] sm:$0xff]  ;;  %v337_v16 = vld [vmem:[%s3157_s1 + $0x30] sm:$0xff]  ;;  %v338_v17 = vld [vmem:[%s3157_s1 + $0x38] sm:$0xff]  ;;  %2167 = vset.pattern.permute.xlu0 %v2412_v55 }
  0x67   : > { %1850 = vmatpush3.msra.mxu0 %v329_v7  ;;  %v339_v18 = vld [vmem:[%s3157_s1 + $0x40] sm:$0xff]  ;;  %v340_v19 = vld [vmem:[%s3157_s1 + $0x48] sm:$0xff]  ;;  %v341_v20 = vld [vmem:[%s3157_s1 + $0x50] sm:$0xff] }
  0x68   : > { %1851 = vmatprep.subr.mxu0 %v328_v9  ;;  %v342_v21 = vld [vmem:[%s3157_s1 + $0x58] sm:$0xff]  ;;  %v343_v22 = vld [vmem:[%s3157_s1 + $0x60] sm:$0xff]  ;;  %v344_v23 = vld [vmem:[%s3157_s1 + $0x68] sm:$0xff] }
  0x69   : > { %1852 = vmatpush3.msra.mxu0 %v328_v9  ;;  %v345_v24 = vld [vmem:[%s3157_s1 + $0x70] sm:$0xff]  ;;  %v346_v25 = vld [vmem:[%s3157_s1 + $0x78] sm:$0xff]  ;;  %v347_v26 = vld [vmem:[%s3157_s1 + $0x80] sm:$0xff] }
  0x6a   : > { %1853 = vmatprep.subr.mxu0 %v327_v10  ;;  %v348_v27 = vld [vmem:[%s3157_s1 + $0x88] sm:$0xff]  ;;  %v349_v28 = vld [vmem:[%s3157_s1 + $0x90] sm:$0xff]  ;;  %v350_v29 = vld [vmem:[%s3157_s1 + $0x98] sm:$0xff] }
  0x6b   : > { %1854 = vmatpush3.msra.mxu0 %v327_v10  ;;  %v351_v30 = vld [vmem:[%s3157_s1 + $0xa0] sm:$0xff]  ;;  %v352_v31 = vld [vmem:[%s3157_s1 + $0xa8] sm:$0xff]  ;;  %v353_v32 = vld [vmem:[%s3157_s1 + $0xb0] sm:$0xff] }
  0x6c   : > { %1856 = vmatmul.mubr.msk.f32.vlgmr.msra.gmra.mxu0 %vm363_vm1, %v332_v11  ;;  %v354_v33 = vld [vmem:[%s3157_s1 + $0xb8] sm:$0xff]  ;;  %v355_v34 = vld [vmem:[%s3157_s1 + $0xc0] sm:$0xff]  ;;  %v356_v35 = vld [vmem:[%s3157_s1 + $0xc8] sm:$0xff] }
  0x6d   : > { %1858 = vmatprep.mubr.msk.f32.mxu0 %vm363_vm1, %v333_v12  ;;  %v357_v36 = vld [vmem:[%s3157_s1 + $0xd0] sm:$0xff]  ;;  %v358_v37 = vld [vmem:[%s3157_s1 + $0xd8] sm:$0xff]  ;;  %v359_v38 = vld [vmem:[%s3157_s1 + $0xe0] sm:$0xff] }
  0x6e   : > { %v360_v39 = vld [vmem:[%s3157_s1 + $0xe8] sm:$0xff]  ;;  %v361_v40 = vld [vmem:[%s3157_s1 + $0xf0] sm:$0xff]  ;;  %v362_v41 = vld [vmem:[%s3157_s1 + $0xf8] sm:$0xff] }
  0x6f   : > { %v2809_v11 = vld [vmem:[#allocation2] sm:$0xff]  ;;  %v2857_v55 = vld [vmem:[#allocation2 + $0x68] sm:$0xff] }
  0x70   : > { %1859 = vmatmul.mubr.msk.f32.gmra.mxu0 %vm363_vm1, %v334_v13 }
  0x71   : > { %1861 = vmatprep.mubr.msk.f32.mxu0 %vm363_vm1, %v335_v14  ;;  %v2813_v14 = vld [vmem:[#allocation2 + $0x38] sm:$0xff] }
  0x74   : > { %1862 = vmatmul.mubr.msk.f32.gmra.mxu0 %vm363_vm1, %v336_v15 }
  0x75   : > { %1864 = vmatprep.mubr.msk.f32.mxu0 %vm363_vm1, %v337_v16 }
  0x78   : > { %1865 = vmatmul.mubr.msk.f32.gmra.mxu0 %vm363_vm1, %v338_v17  ;;  %v2818_v17 = vld [vmem:[#allocation2 + $0x30] sm:$0xff] }
  0x79   : > { %1867 = vmatprep.mubr.msk.f32.mxu0 %vm363_vm1, %v339_v18  ;;  %v2820_v18 = vld [vmem:[#allocation2 + $0x48] sm:$0xff] }
  0x7c   : > { %1868 = vmatmul.mubr.msk.f32.gmra.mxu0 %vm363_vm1, %v340_v19 }
  0x7d   : > { %1870 = vmatprep.mubr.msk.f32.mxu0 %vm363_vm1, %v341_v20 }
  0x80   : > { %1871 = vmatmul.mubr.msk.f32.gmra.mxu0 %vm363_vm1, %v342_v21 }
  0x81   : > { %1873 = vmatprep.mubr.msk.f32.mxu0 %vm363_vm1, %v343_v22 }
  0x84   : > { %1874 = vmatmul.mubr.msk.f32.gmra.mxu0 %vm363_vm1, %v344_v23  ;;  %v718_v23 = vld [vmem:[#allocation2 + $0x8] sm:$0xff] }
  0x85   : > { %1876 = vmatprep.mubr.msk.f32.mxu0 %vm363_vm1, %v345_v24  ;;  %v2831_v24 = vld [vmem:[#allocation2 + $0x40] sm:$0xff] }
  0x88   : > { %1877 = vmatmul.mubr.msk.f32.gmra.mxu0 %vm363_vm1, %v346_v25 }
  0x89   : > { %1879 = vmatprep.mubr.msk.f32.mxu0 %vm363_vm1, %v347_v26 }
  0x8c   : > { %1880 = vmatmul.mubr.msk.f32.gmra.mxu0 %vm363_vm1, %v348_v27 }
  0x8d   : > { %1882 = vmatprep.mubr.msk.f32.mxu0 %vm363_vm1, %v349_v28 }
  0x90   : > { %1883 = vmatmul.mubr.msk.f32.gmra.mxu0 %vm363_vm1, %v350_v29  ;;  %v719_v29 = vld [vmem:[#allocation2 + $0x10] sm:$0xff] }
  0x91   : > { %1885 = vmatprep.mubr.msk.f32.mxu0 %vm363_vm1, %v351_v30  ;;  %v2841_v30 = vld [vmem:[#allocation2 + $0x58] sm:$0xff] }
  0x94   : > { %1886 = vmatmul.mubr.msk.f32.gmra.mxu0 %vm363_vm1, %v352_v31 }
  0x95   : > { %1888 = vmatprep.mubr.msk.f32.mxu0 %vm363_vm1, %v353_v32 }
  0x98   : > { %1889 = vmatmul.mubr.msk.f32.gmra.mxu0 %vm363_vm1, %v354_v33 }
  0x99   : > { %1891 = vmatprep.mubr.msk.f32.mxu0 %vm363_vm1, %v355_v34 }
  0x9c   : > { %1892 = vmatmul.mubr.msk.f32.gmra.mxu0 %vm363_vm1, %v356_v35  ;;  %v720_v35 = vld [vmem:[#allocation2 + $0x18] sm:$0xff] }
  0x9d   : > { %1894 = vmatprep.mubr.msk.f32.mxu0 %vm363_vm1, %v357_v36  ;;  %v2849_v36 = vld [vmem:[#allocation2 + $0x50] sm:$0xff] }
  0xa0   : > { %1895 = vmatmul.mubr.msk.f32.gmra.mxu0 %vm363_vm1, %v358_v37 }
  0xa1   : > { %1897 = vmatprep.mubr.msk.f32.mxu0 %vm363_vm1, %v359_v38 }
  0xa4   : > { %1898 = vmatmul.mubr.msk.f32.gmra.mxu0 %vm363_vm1, %v360_v39 }
  0xa5   : > { %1900 = vmatprep.mubr.msk.f32.mxu0 %vm363_vm1, %v361_v40 }
  0xa8   : > { %1901 = vmatmul.mubr.msk.f32.gmra.mxu0 %vm363_vm1, %v362_v41  ;;  %v721_v41 = vld [vmem:[#allocation2 + $0x20] sm:$0xff] }
 0x12c   : > { %v2737_v42 = vpop.f32.mrf.mxu0 }
 0x12e   : > { %v2739_v43 = vpop.f32.mrf.mxu0 }
 0x12f   : > { %685 = vmax.xlane.f32.xlu0 %v2739_v43 }
 0x130   : > { %v2742_v44 = vpop.f32.mrf.mxu0 }
 0x132   : > { %v2744_v45 = vpop.f32.mrf.mxu0 }
 0x134   : > { %v2746_v46 = vpop.f32.mrf.mxu0 }
 0x136   : > { %v2748_v47 = vpop.f32.mrf.mxu0 }
 0x138   : > { %v2750_v48 = vpop.f32.mrf.mxu0 }
 0x139   : > { %699 = vmax.xlane.f32.xlu0 %v2750_v48 }
 0x13a   : > { %v2753_v49 = vpop.f32.mrf.mxu0 }
 0x13c   : > { %v2755_v50 = vpop.f32.mrf.mxu0 }
 0x13d   : > { %697 = vmax.xlane.f32.xlu0 %v2753_v49  ;;  %703 = vmax.xlane.f32.xlu1 %v2755_v50 }
 0x13e   : > { %v2759_v51 = vpop.f32.mrf.mxu0 }
 0x140   : > { %v2761_v52 = vpop.f32.mrf.mxu0 }
 0x141   : > { %687 = vmax.xlane.f32.xlu0 %v2737_v42  ;;  %701 = vmax.xlane.f32.xlu1 %v2759_v51 }
 0x142   : > { %v2765_v53 = vpop.f32.mrf.mxu0 }
 0x144   : > { %v2767_v54 = vpop.f32.mrf.mxu0 }
 0x145   : > { %689 = vmax.xlane.f32.xlu0 %v2744_v45  ;;  %707 = vmax.xlane.f32.xlu1 %v2761_v52 }
 0x146   : > { %v2771_v56 = vpop.f32.mrf.mxu0 }
 0x148   : > { %v2773_v57 = vpop.f32.mrf.mxu0 }
 0x149   : > { %691 = vmax.xlane.f32.xlu0 %v2742_v44  ;;  %705 = vmax.xlane.f32.xlu1 %v2765_v53 }
 0x14a   : > { %v2777_v58 = vpop.f32.mrf.mxu0 }
 0x14c   : > { %v2779_v59 = vpop.f32.mrf.mxu0 }
 0x14d   : > { %693 = vmax.xlane.f32.xlu0 %v2748_v47  ;;  %711 = vmax.xlane.f32.xlu1 %v2767_v54 }
 0x14e   : > { %v2783_v60 = vpop.f32.mrf.mxu0 }
 0x150   : > { %v2785_v61 = vpop.f32.mrf.mxu0 }
 0x151   : > { %695 = vmax.xlane.f32.xlu0 %v2746_v46  ;;  %709 = vmax.xlane.f32.xlu1 %v2771_v56 }
 0x152   : > { %v2789_v62 = vpop.f32.mrf.mxu0 }
 0x154   : > { %v1887_v63 = vpop.f32.mrf.mxu0 }
 0x155   : > { %715 = vmax.xlane.f32.xlu1 %v2773_v57 }
 0x156   : > { %v626_v0 = vpop.f32.mrf.mxu0 }
 0x158   : > { %v1890_v1 = vpop.f32.mrf.mxu0 }
 0x159   : > { %713 = vmax.xlane.f32.xlu1 %v2777_v58 }
 0x15a   : > { %v636_v2 = vpop.f32.mrf.mxu0 }
 0x15c   : > { %v1893_v3 = vpop.f32.mrf.mxu0 }
 0x15e   : > { %v646_v4 = vpop.f32.mrf.mxu0 }
 0x160   : > { %v1896_v5 = vpop.f32.mrf.mxu0 }
 0x162   : > { %v656_v6 = vpop.f32.mrf.mxu0 }
 0x164   : > { %v1899_v7 = vpop.f32.mrf.mxu0 }
 0x166   : > { %v666_v8 = vpop.f32.mrf.mxu0 }
 0x168   : > { %v1902_v9 = vpop.f32.mrf.mxu0 }
 0x169   : > { %1903 = vmatprep.subr.mxu0 %v1902_v9  ;;  %1997 = vmatprep.subr.mxu1 %v1902_v9 }
 0x16a   : > { %1904 = vmatpush3.xpose.msra.mxu0 %v1902_v9  ;;  %2013 = vmatpush3.xpose.msra.mxu1 %v1902_v9  ;;  %v676_v10 = vpop.f32.mrf.mxu0  ;;  %v2877_v9 = vld [vmem:[#allocation2 + $0x78] sm:$0xff] }
 0x16b   : > { %1905 = vmatprep.subr.mxu0 %v676_v10  ;;  %1998 = vmatprep.subr.mxu1 %v676_v10 }
 0x16e   : > { %1906 = vmatpush3.xpose.msra.mxu0 %v676_v10  ;;  %2014 = vmatpush3.xpose.msra.mxu1 %v676_v10 }
 0x16f   : > { %1907 = vmatprep.subr.mxu0 %v1899_v7  ;;  %1999 = vmatprep.subr.mxu1 %v1899_v7 }
 0x172   : > { %1908 = vmatpush3.xpose.msra.mxu0 %v1899_v7  ;;  %2015 = vmatpush3.xpose.msra.mxu1 %v1899_v7 }
 0x173   : > { %1909 = vmatprep.subr.mxu0 %v666_v8  ;;  %2000 = vmatprep.subr.mxu1 %v666_v8 }
 0x176   : > { %1910 = vmatpush3.xpose.msra.mxu0 %v666_v8  ;;  %2016 = vmatpush3.xpose.msra.mxu1 %v666_v8 }
 0x177   : > { %1911 = vmatprep.subr.mxu0 %v1896_v5  ;;  %2001 = vmatprep.subr.mxu1 %v1896_v5 }
 0x17a   : > { %1912 = vmatpush3.xpose.msra.mxu0 %v1896_v5  ;;  %2017 = vmatpush3.xpose.msra.mxu1 %v1896_v5 }
 0x17b   : > { %1913 = vmatprep.subr.mxu0 %v656_v6  ;;  %2002 = vmatprep.subr.mxu1 %v656_v6 }
 0x17e   : > { %1914 = vmatpush3.xpose.msra.mxu0 %v656_v6  ;;  %2018 = vmatpush3.xpose.msra.mxu1 %v656_v6 }
 0x17f   : > { %1915 = vmatprep.subr.mxu0 %v1893_v3  ;;  %2003 = vmatprep.subr.mxu1 %v1893_v3 }
 0x182   : > { %1916 = vmatpush3.xpose.msra.mxu0 %v1893_v3  ;;  %2019 = vmatpush3.xpose.msra.mxu1 %v1893_v3 }
 0x183   : > { %1917 = vmatprep.subr.mxu0 %v646_v4  ;;  %2004 = vmatprep.subr.mxu1 %v646_v4 }
 0x186   : > { %1918 = vmatpush3.xpose.msra.mxu0 %v646_v4  ;;  %2020 = vmatpush3.xpose.msra.mxu1 %v646_v4 }
 0x187   : > { %1919 = vmatprep.subr.mxu0 %v1890_v1  ;;  %2005 = vmatprep.subr.mxu1 %v1890_v1 }
 0x18a   : > { %1920 = vmatpush3.xpose.msra.mxu0 %v1890_v1  ;;  %2021 = vmatpush3.xpose.msra.mxu1 %v1890_v1  ;;  %v2867_v1 = vld [vmem:[#allocation2 + $0x60] sm:$0xff] }
 0x18b   : > { %1921 = vmatprep.subr.mxu0 %v636_v2  ;;  %2006 = vmatprep.subr.mxu1 %v636_v2 }
 0x18e   : > { %1922 = vmatpush3.xpose.msra.mxu0 %v636_v2  ;;  %2022 = vmatpush3.xpose.msra.mxu1 %v636_v2 }
 0x18f   : > { %1923 = vmatprep.subr.mxu0 %v1887_v63  ;;  %2007 = vmatprep.subr.mxu1 %v1887_v63 }
 0x192   : > { %1924 = vmatpush3.xpose.msra.mxu0 %v1887_v63  ;;  %2023 = vmatpush3.xpose.msra.mxu1 %v1887_v63 }
 0x193   : > { %1925 = vmatprep.subr.mxu0 %v626_v0  ;;  %2008 = vmatprep.subr.mxu1 %v626_v0 }
 0x196   : > { %1926 = vmatpush3.xpose.msra.mxu0 %v626_v0  ;;  %2024 = vmatpush3.xpose.msra.mxu1 %v626_v0  ;;  %v722_v0 = vld [vmem:[#allocation2 + $0x28] sm:$0xff] }
 0x197   : > { %1927 = vmatprep.subr.mxu0 %v2785_v61  ;;  %2009 = vmatprep.subr.mxu1 %v2785_v61 }
 0x19a   : > { %1928 = vmatpush3.xpose.msra.mxu0 %v2785_v61  ;;  %2025 = vmatpush3.xpose.msra.mxu1 %v2785_v61 }
 0x19b   : > { %1929 = vmatprep.subr.mxu0 %v2789_v62  ;;  %2010 = vmatprep.subr.mxu1 %v2789_v62 }
 0x19e   : > { %1930 = vmatpush3.xpose.msra.mxu0 %v2789_v62  ;;  %2026 = vmatpush3.xpose.msra.mxu1 %v2789_v62 }
 0x19f   : > { %1931 = vmatprep.subr.mxu0 %v2779_v59  ;;  %2011 = vmatprep.subr.mxu1 %v2779_v59 }
 0x1a2   : > { %1932 = vmatpush3.xpose.msra.mxu0 %v2779_v59  ;;  %2027 = vmatpush3.xpose.msra.mxu1 %v2779_v59 }
 0x1a3   : > { %1933 = vmatprep.subr.mxu0 %v2783_v60  ;;  %2012 = vmatprep.subr.mxu1 %v2783_v60 }
 0x1a6   : > { %1934 = vmatpush3.xpose.msra.mxu0 %v2783_v60  ;;  %2028 = vmatpush3.xpose.msra.mxu1 %v2783_v60 }
 0x1b8   : > { %v686_v12 = vpop.xlane.xlu0 %685 }
 0x1b9   : > { %v733_v13 = vmax.f32 %v2809_v11, %v686_v12 }
 0x1bb   : > { %1311 = vst.msk [vmem:[#allocation2] sm:$0xff] %vm1005_vm2, %v733_v13  ;;  %v749_v61 = vsub.f32 %v2809_v11, %v733_v13 }
 0x1bd   : > { %v765_v5 = vmul.f32 1.442695, %v749_v61 }
 0x1bf   : > { %2169 = vpow2.f32 %v765_v5 }
 0x1c2   : > { %v700_v15 = vpop.xlane.xlu0 %699 }
 0x1c3   : > { %v2816_v16 = vmax.f32 %v2813_v14, %v700_v15 }
 0x1c5   : > { %1318 = vst.msk [vmem:[#allocation2 + $0x38] sm:$0xff] %vm1005_vm2, %v2816_v16  ;;  %834 = vperm.xlu1 %2168, %v2816_v16  }
 0x1c6   : > { %v698_v19 = vpop.xlane.xlu0 %697  ;;  %v704_v20 = vpop.xlane.xlu1 %703 }
 0x1c7   : > { %v2826_v21 = vmax.f32 %v2818_v17, %v698_v19  ;;  %v2829_v22 = vmax.f32 %v2820_v18, %v704_v20  ;;  %v2887_v20 = vld [vmem:[#allocation2 + $0x70] sm:$0xff] }
 0x1c9   : > { %1317 = vst.msk [vmem:[#allocation2 + $0x30] sm:$0xff] %vm1005_vm2, %v2826_v21  ;;  %1320 = vst.msk [vmem:[#allocation2 + $0x48] sm:$0xff] %vm1005_vm2, %v2829_v22  ;;  %829 = vperm.xlu0 %2167, %v2826_v21   ;;  %799 = vperm.xlu1 %2168, %v733_v13  }
 0x1ca   : > { %v688_v25 = vpop.xlane.xlu0 %687  ;;  %v702_v26 = vpop.xlane.xlu1 %701 }
 0x1cb   : > { %v734_v27 = vmax.f32 %v718_v23, %v688_v25  ;;  %v2839_v28 = vmax.f32 %v2831_v24, %v702_v26  ;;  %v756_v25 = vsub.f32 %v2813_v14, %v2816_v16  ;;  %v755_v14 = vsub.f32 %v2818_v17, %v2826_v21 }
 0x1cc   : > { %v758_v16 = vsub.f32 %v2820_v18, %v2829_v22  ;;  %v2913_v17 = vpop.eup %2169 }
 0x1cd   : > { %1312 = vst.msk [vmem:[#allocation2 + $0x8] sm:$0xff] %vm1005_vm2, %v734_v27  ;;  %1319 = vst.msk [vmem:[#allocation2 + $0x40] sm:$0xff] %vm1005_vm2, %v2839_v28  ;;  %804 = vperm.xlu1 %2168, %v734_v27   ;;  %v750_v2 = vsub.f32 %v718_v23, %v734_v27 }
 0x1ce   : > { %v690_v31 = vpop.xlane.xlu0 %689  ;;  %v708_v32 = vpop.xlane.xlu1 %707 }
 0x1cf   : > { %v735_v33 = vmax.f32 %v719_v29, %v690_v31  ;;  %v2847_v34 = vmax.f32 %v2841_v30, %v708_v32  ;;  %v767_v10 = vmul.f32 1.442695, %v750_v2 }
 0x1d1   : > { %1313 = vst.msk [vmem:[#allocation2 + $0x10] sm:$0xff] %vm1005_vm2, %v735_v33  ;;  %1322 = vst.msk [vmem:[#allocation2 + $0x58] sm:$0xff] %vm1005_vm2, %v2847_v34  ;;  %809 = vperm.xlu1 %2168, %v735_v33   ;;  %v751_v11 = vsub.f32 %v719_v29, %v735_v33  ;;  %2171 = vpow2.f32 %v767_v10 }
 0x1d2   : > { %v692_v37 = vpop.xlane.xlu0 %691  ;;  %v706_v38 = vpop.xlane.xlu1 %705 }
 0x1d3   : > { %v736_v39 = vmax.f32 %v720_v35, %v692_v37  ;;  %v2855_v40 = vmax.f32 %v2849_v36, %v706_v38  ;;  %v769_v26 = vmul.f32 1.442695, %v751_v11  ;;  %v777_v38 = vmul.f32 1.442695, %v755_v14 }
 0x1d5   : > { %1314 = vst.msk [vmem:[#allocation2 + $0x18] sm:$0xff] %vm1005_vm2, %v736_v39  ;;  %1321 = vst.msk [vmem:[#allocation2 + $0x50] sm:$0xff] %vm1005_vm2, %v2855_v40  ;;  %844 = vperm.xlu1 %2168, %v2829_v22   ;;  %v752_v6 = vsub.f32 %v720_v35, %v736_v39  ;;  %v779_v35 = vmul.f32 1.442695, %v756_v25  ;;  %v759_v21 = vsub.f32 %v2849_v36, %v2855_v40 }
 0x1d6   : > { %v694_v59 = vpop.xlane.xlu0 %693  ;;  %v712_v60 = vpop.xlane.xlu1 %711 }
 0x1d7   : > { %v737_v62 = vmax.f32 %v721_v41, %v694_v59  ;;  %v2865_v63 = vmax.f32 %v2857_v55, %v712_v60  ;;  %v771_v13 = vmul.f32 1.442695, %v752_v6  ;;  %v760_v59 = vsub.f32 %v2841_v30, %v2847_v34 }
 0x1d8   : > { %v785_v30 = vmul.f32 1.442695, %v759_v21 }
 0x1d9   : > { %1315 = vst.msk [vmem:[#allocation2 + $0x20] sm:$0xff] %vm1005_vm2, %v737_v62  ;;  %1324 = vst.msk [vmem:[#allocation2 + $0x68] sm:$0xff] %vm1005_vm2, %v2865_v63  ;;  %864 = vperm.xlu0 %2167, %v2865_v63   ;;  %839 = vperm.xlu1 %2168, %v2839_v28   ;;  %2173 = vpow2.f32 %v771_v13  ;;  %v753_v29 = vsub.f32 %v721_v41, %v737_v62  ;;  %v783_v41 = vmul.f32 1.442695, %v758_v16  ;;  %v787_v60 = vmul.f32 1.442695, %v760_v59 }
 0x1da   : > { %v696_v3 = vpop.xlane.xlu0 %695  ;;  %v710_v4 = vpop.xlane.xlu1 %709  ;;  %2175 = vpow2.f32 %v769_v26 }
 0x1db   : > { %v738_v7 = vmax.f32 %v722_v0, %v696_v3  ;;  %v2875_v8 = vmax.f32 %v2867_v1, %v710_v4  ;;  %v773_v37 = vmul.f32 1.442695, %v753_v29 }
 0x1dd   : > { %1316 = vst.msk [vmem:[#allocation2 + $0x28] sm:$0xff] %vm1005_vm2, %v738_v7  ;;  %1323 = vst.msk [vmem:[#allocation2 + $0x60] sm:$0xff] %vm1005_vm2, %v2875_v8  ;;  %859 = vperm.xlu0 %2167, %v2875_v8   ;;  %854 = vperm.xlu1 %2168, %v2847_v34   ;;  %v754_v15 = vsub.f32 %v722_v0, %v738_v7  ;;  %v761_v36 = vsub.f32 %v2867_v1, %v2875_v8 }
 0x1de   : > { %v716_v12 = vpop.xlane.xlu1 %715  ;;  %v2918_v22 = vpop.eup %2171 }
 0x1df   : > { %v2885_v19 = vmax.f32 %v2877_v9, %v716_v12  ;;  %v775_v31 = vmul.f32 1.442695, %v754_v15 }
 0x1e1   : > { %v764_v23 = vsub.f32 %v2877_v9, %v2885_v19  ;;  %1326 = vst.msk [vmem:[#allocation2 + $0x78] sm:$0xff] %vm1005_vm2, %v2885_v19  ;;  %849 = vperm.xlu1 %2168, %v2855_v40   ;;  %2177 = vpow2.f32 %v775_v31 }
 0x1e2   : > { %v714_v27 = vpop.xlane.xlu1 %713  ;;  %2179 = vpow2.f32 %v779_v35 }
 0x1e3   : > { %v2897_v32 = vmax.f32 %v2887_v20, %v714_v27  ;;  %2181 = vpow2.f32 %v773_v37 }
 0x1e4   : > { %2183 = vpow2.f32 %v777_v38 }
 0x1e5   : > { %v763_v33 = vsub.f32 %v2887_v20, %v2897_v32  ;;  %1325 = vst.msk [vmem:[#allocation2 + $0x70] sm:$0xff] %vm1005_vm2, %v2897_v32  ;;  %814 = vperm.xlu1 %2168, %v736_v39   ;;  %869 = vperm.xlu0 %2167, %v2897_v32   ;;  %v757_v39 = vsub.f32 %v2831_v24, %v2839_v28  ;;  %2185 = vpow2.f32 %v783_v41 }
 0x1e6   : > { %v762_v24 = vsub.f32 %v2857_v55, %v2865_v63  ;;  %v2922_v28 = vpop.eup %2173 }
 0x1e7   : > { %v781_v18 = vmul.f32 1.442695, %v757_v39  ;;  %v2926_v34 = vpop.eup %2175 }
 0x1e8   : > { %v791_v61 = vmul.f32 1.442695, %v762_v24 }
 0x1e9   : > { %819 = vperm.xlu1 %2168, %v737_v62   ;;  %874 = vperm.xlu0 %2167, %v2885_v19   ;;  %2187 = vpow2.f32 %v781_v18  ;;  %v789_v62 = vmul.f32 1.442695, %v761_v36 }
 0x1ea   : > { %2189 = vpow2.f32 %v787_v60 }
 0x1eb   : > { %2191 = vpow2.f32 %v785_v30 }
 0x1ec   : > { %2193 = vpow2.f32 %v791_v61 }
 0x1ed   : > { %824 = vperm.xlu1 %2168, %v738_v7   ;;  %1185 = vperm.xlu0 %2167, %v2913_v17   ;;  %2195 = vpow2.f32 %v789_v62 }
 0x1ee   : > { %v2930_v40 = vpop.eup %2177 }
 0x1ef   : > { %v2934_v55 = vpop.eup %2179 }
 0x1f0   : > { %v2936_v63 = vpop.eup %2181 }
 0x1f1   : > { %1190 = vperm.xlu1 %2168, %v2918_v22   ;;  %1200 = vperm.xlu0 %2167, %v2922_v28   ;;  %v2940_v0 = vpop.eup %2183 }
 0x1f2   : > { %v2942_v1 = vpop.eup %2185 }
 0x1f5   : > { %1195 = vperm.xlu1 %2168, %v2926_v34   ;;  %1210 = vperm.xlu0 %2167, %v2930_v40  }
 0x1f6   : > { %v2946_v2 = vpop.eup %2187 }
 0x1f7   : > { %v2948_v3 = vpop.eup %2189 }
 0x1f8   : > { %v2952_v4 = vpop.eup %2191 }
 0x1f9   : > { %1205 = vperm.xlu1 %2168, %v2936_v63   ;;  %1220 = vperm.xlu0 %2167, %v2934_v55   ;;  %v2954_v5 = vpop.eup %2193 }
 0x1fa   : > { %v2958_v6 = vpop.eup %2195 }
 0x1fd   : > { %1215 = vperm.xlu1 %2168, %v2940_v0   ;;  %1230 = vperm.xlu0 %2167, %v2942_v1  }
 0x201   : > { %1225 = vperm.xlu1 %2168, %v2946_v2   ;;  %1240 = vperm.xlu0 %2167, %v2948_v3  }
 0x205   : > { %1235 = vperm.xlu1 %2168, %v2952_v4   ;;  %1250 = vperm.xlu0 %2167, %v2954_v5  }
 0x209   : > { %1245 = vperm.xlu1 %2168, %v2958_v6  }
 0x240   : > { %v835_v7 = vpop.permute.xlu1 %834 }
 0x241   : > { %v884_v8 = vsub.f32 %v2750_v48, %v835_v7 }
 0x243   : > { %v907_v15 = vmul.f32 1.442695, %v884_v8 }
 0x244   : > { %v830_v10 = vpop.permute.xlu0 %829  ;;  %v800_v11 = vpop.permute.xlu1 %799 }
 0x245   : > { %v883_v12 = vsub.f32 %v2753_v49, %v830_v10  ;;  %v877_v13 = vsub.f32 %v2739_v43, %v800_v11 }
 0x247   : > { %v905_v25 = vmul.f32 1.442695, %v883_v12  ;;  %v893_v26 = vmul.f32 1.442695, %v877_v13 }
 0x248   : > { %v805_v27 = vpop.permute.xlu1 %804 }
 0x249   : > { %2197 = vpow2.f32 %v905_v25  ;;  %v878_v29 = vsub.f32 %v2737_v42, %v805_v27 }
 0x24a   : > { %2199 = vpow2.f32 %v893_v26 }
 0x24b   : > { %2201 = vpow2.f32 %v907_v15  ;;  %v895_v31 = vmul.f32 1.442695, %v878_v29 }
 0x24c   : > { %v810_v35 = vpop.permute.xlu1 %809 }
 0x24d   : > { %2203 = vpow2.f32 %v895_v31  ;;  %v879_v48 = vsub.f32 %v2744_v45, %v810_v35 }
 0x24f   : > { %v897_v14 = vmul.f32 1.442695, %v879_v48 }
 0x250   : > { %v845_v16 = vpop.permute.xlu1 %844 }
 0x251   : > { %2205 = vpow2.f32 %v897_v14  ;;  %v886_v49 = vsub.f32 %v2755_v50, %v845_v16 }
 0x253   : > { %v911_v42 = vmul.f32 1.442695, %v886_v49 }
 0x254   : > { %v865_v43 = vpop.permute.xlu0 %864  ;;  %v840_v37 = vpop.permute.xlu1 %839 }
 0x255   : > { %v885_v38 = vsub.f32 %v2759_v51, %v840_v37  ;;  %v890_v62 = vsub.f32 %v2767_v54, %v865_v43 }
 0x256   : > { %v2968_v39 = vpop.eup %2197 }
 0x257   : > { %v2200_v41 = vpop.eup %2199  ;;  %v909_v59 = vmul.f32 1.442695, %v885_v38  ;;  %1944 = vmatprep.mubr.f32.mxu1 %v2968_v39  ;;  %v919_v12 = vmul.f32 1.442695, %v890_v62  ;;  %v926_v62 = vld [vmem:[#allocation3 + $0x8] sm:$0xff] }
 0x258   : > { %v2971_v18 = vpop.eup %2201  ;;  %957 = vadd.xlane.f32.xlu1 %v2200_v41  ;;  %1935 = vmatprep.mubr.f32.mxu0 %v2200_v41  ;;  %v860_v45 = vpop.permute.xlu0 %859  ;;  %v793_v41 = vmul.f32 1.442695, %v763_v33 }
 0x259   : > { %v855_v21 = vpop.permute.xlu1 %854  ;;  %1945 = vmatmul.mubr.f32.vlgmr.msra.gmra.mxu1 %v2971_v18  ;;  %2207 = vpow2.f32 %v909_v59  ;;  %v889_v51 = vsub.f32 %v2771_v56, %v860_v45 }
 0x25a   : > { %v2204_v50 = vpop.eup %2203  ;;  %v888_v60 = vsub.f32 %v2761_v52, %v855_v21  ;;  %2209 = vpow2.f32 %v911_v42  ;;  %v795_v42 = vmul.f32 1.442695, %v764_v23 }
 0x25b   : > { %959 = vadd.xlane.f32.xlu0 %v2204_v50  ;;  %1936 = vmatmul.mubr.f32.vlgmr.msra.gmra.mxu0 %v2204_v50  ;;  %v917_v7 = vmul.f32 1.442695, %v889_v51 }
 0x25c   : > { %v915_v36 = vmul.f32 1.442695, %v888_v60 }
 0x25d   : > { %v850_v24 = vpop.permute.xlu1 %849 }
 0x25e   : > { %v887_v30 = vsub.f32 %v2765_v53, %v850_v24  ;;  %v2206_v61 = vpop.eup %2205 }
 0x25f   : > { %961 = vadd.xlane.f32.xlu0 %v2206_v61  ;;  %1938 = vmatprep.mubr.f32.mxu0 %v2206_v61 }
 0x260   : > { %v913_v8 = vmul.f32 1.442695, %v887_v30  ;;  %v870_v10 = vpop.permute.xlu0 %869  ;;  %v925_v30 = vld [vmem:[#allocation3] sm:$0xff] }
 0x261   : > { %v815_v11 = vpop.permute.xlu1 %814  ;;  %v891_v52 = vsub.f32 %v2777_v58, %v870_v10  ;;  %v942_v10 = vmul.f32 %v2918_v22, %v926_v62  ;;  %v937_v62 = vld [vmem:[#allocation3 + $0x60] sm:$0xff] }
 0x262   : > { %2211 = vpow2.f32 %v913_v8  ;;  %v880_v56 = vsub.f32 %v2742_v44, %v815_v11 }
 0x263   : > { %2213 = vpow2.f32 %v915_v36  ;;  %v921_v53 = vmul.f32 1.442695, %v891_v52  ;;  %v941_v36 = vmul.f32 %v2913_v17, %v925_v30  ;;  %v927_v52 = vld [vmem:[#allocation3 + $0x10] sm:$0xff] }
 0x264   : > { %2215 = vpow2.f32 %v917_v7  ;;  %v899_v13 = vmul.f32 1.442695, %v880_v56  ;;  %v875_v15 = vpop.permute.xlu0 %874 }
 0x265   : > { %v820_v25 = vpop.permute.xlu1 %819  ;;  %v892_v54 = vsub.f32 %v2773_v57, %v875_v15  ;;  %v928_v15 = vld [vmem:[#allocation3 + $0x18] sm:$0xff] }
 0x266   : > { %v881_v26 = vsub.f32 %v2748_v47, %v820_v25  ;;  %2217 = vpow2.f32 %v899_v13  ;;  %v2208_v27 = vpop.eup %2207  ;;  %v944_v17 = vmul.f32 %v2922_v28, %v928_v15  ;;  %v1174_v15 = vld [vmem:[#allocation4 + $0x48] sm:$0xff] }
 0x267   : > { %2219 = vpow2.f32 %v919_v12  ;;  %v923_v29 = vmul.f32 1.442695, %v892_v54  ;;  %v2210_v35 = vpop.eup %2209  ;;  %1947 = vmatprep.mubr.f32.mxu1 %v2208_v27  ;;  %v943_v12 = vmul.f32 %v2926_v34, %v927_v52  ;;  %v929_v54 = vld [vmem:[#allocation3 + $0x20] sm:$0xff] }
 0x268   : > { %v901_v31 = vmul.f32 1.442695, %v881_v26  ;;  %2221 = vpow2.f32 %v921_v53  ;;  %1948 = vmatmul.mubr.f32.gmra.mxu1 %v2210_v35  ;;  %v2999_v45 = vpop.permute.xlu0 %1185  ;;  %v945_v22 = vmul.f32 %v2936_v63, %v929_v54  ;;  %v1168_v54 = vld [vmem:[#allocation4] sm:$0xff] }
 0x269   : > { %v825_v44 = vpop.permute.xlu1 %824  ;;  %2223 = vpow2.f32 %v923_v29 }
 0x26a   : > { %v882_v58 = vsub.f32 %v2746_v46, %v825_v44  ;;  %2225 = vpow2.f32 %v901_v31  ;;  %v931_v31 = vld [vmem:[#allocation3 + $0x30] sm:$0xff] }
 0x26b   : > { %v947_v44 = vmul.f32 %v2940_v0, %v931_v31 }
 0x26c   : > { %v903_v48 = vmul.f32 1.442695, %v882_v58  ;;  %v3003_v32 = vpop.permute.xlu0 %1200 }
 0x26e   : > { %2227 = vpow2.f32 %v903_v48  ;;  %v932_v48 = vld [vmem:[#allocation3 + $0x38] sm:$0xff] }
 0x26f   : > { %v2212_v14 = vpop.eup %2211  ;;  %2229 = vpow2.f32 %v793_v41  ;;  %v948_v63 = vmul.f32 %v2934_v55, %v932_v48  ;;  %v936_v55 = vld [vmem:[#allocation3 + $0x58] sm:$0xff] }
 0x270   : > { %v2214_v57 = vpop.eup %2213  ;;  %1950 = vmatprep.mubr.f32.mxu1 %v2212_v14  ;;  %2231 = vpow2.f32 %v795_v42  ;;  %v3007_v19 = vpop.permute.xlu0 %1210 }
 0x271   : > { %v2216_v47 = vpop.eup %2215  ;;  %1951 = vmatmul.mubr.f32.gmra.mxu1 %v2214_v57 }
 0x272   : > { %1953 = vmatprep.mubr.f32.mxu1 %v2216_v47 }
 0x273   : > { %v2218_v16 = vpop.eup %2217 }
 0x274   : > { %v2220_v49 = vpop.eup %2219  ;;  %963 = vadd.xlane.f32.xlu1 %v2218_v16  ;;  %1939 = vmatmul.mubr.f32.gmra.mxu0 %v2218_v16  ;;  %v3011_v33 = vpop.permute.xlu0 %1220 }
 0x275   : > { %v2222_v43 = vpop.eup %2221  ;;  %1954 = vmatmul.mubr.f32.gmra.mxu1 %v2220_v49 }
 0x276   : > { %v2224_v37 = vpop.eup %2223  ;;  %1956 = vmatprep.mubr.f32.mxu1 %v2222_v43 }
 0x277   : > { %v2226_v38 = vpop.eup %2225 }
 0x278   : > { %965 = vadd.xlane.f32.xlu0 %v2226_v38  ;;  %1941 = vmatprep.mubr.f32.mxu0 %v2226_v38  ;;  %v3015_v50 = vpop.permute.xlu0 %1230  ;;  %v935_v38 = vld [vmem:[#allocation3 + $0x50] sm:$0xff] }
 0x279   : > { %1957 = vmatmul.mubr.f32.gmra.mxu1 %v2224_v37  ;;  %v951_v41 = vmul.f32 %v2952_v4, %v935_v38 }
 0x27b   : > { %v2228_v46 = vpop.eup %2227 }
 0x27c   : > { %967 = vadd.xlane.f32.xlu1 %v2228_v46  ;;  %1942 = vmatmul.mubr.f32.gmra.mxu0 %v2228_v46  ;;  %v3019_v51 = vpop.permute.xlu0 %1240 }
 0x27d   : > { %969 = vadd.xlane.f32.xlu0 %v2968_v39  ;;  %v2991_v39 = vpop.eup %2229 }
 0x27e   : > { %v2994_v59 = vpop.eup %2231 }
 0x280   : > { %971 = vadd.xlane.f32.xlu1 %v2971_v18  ;;  %v2997_v18 = vpop.permute.xlu1 %1190  ;;  %v3023_v61 = vpop.permute.xlu0 %1250 }
 0x281   : > { %973 = vadd.xlane.f32.xlu0 %v2208_v27  ;;  %v930_v27 = vld [vmem:[#allocation3 + $0x28] sm:$0xff] }
 0x282   : > { %v946_v34 = vmul.f32 %v2930_v40, %v930_v27  ;;  %v934_v40 = vld [vmem:[#allocation3 + $0x48] sm:$0xff]  ;;  %v1270_v27 = vmul.f32 %v3011_v33, %v1174_v15  ;;  %v1171_v15 = vld [vmem:[#allocation4 + $0x50] sm:$0xff] }
 0x283   : > { %v950_v46 = vmul.f32 %v2942_v1, %v934_v40  ;;  %v938_v1 = vld [vmem:[#allocation3 + $0x68] sm:$0xff] }
 0x284   : > { %975 = vadd.xlane.f32.xlu1 %v2210_v35  ;;  %v3001_v20 = vpop.permute.xlu1 %1195 }
 0x285   : > { %977 = vadd.xlane.f32.xlu0 %v2212_v14 }
 0x288   : > { %979 = vadd.xlane.f32.xlu1 %v2214_v57  ;;  %v3005_v9 = vpop.permute.xlu1 %1205  ;;  %v933_v57 = vld [vmem:[#allocation3 + $0x40] sm:$0xff] }
 0x289   : > { %981 = vadd.xlane.f32.xlu0 %v2216_v47  ;;  %v949_v16 = vmul.f32 %v2946_v2, %v933_v57 }
 0x28c   : > { %983 = vadd.xlane.f32.xlu1 %v2220_v49  ;;  %v3009_v23 = vpop.permute.xlu1 %1215 }
 0x28d   : > { %985 = vadd.xlane.f32.xlu0 %v2222_v43 }
 0x290   : > { %987 = vadd.xlane.f32.xlu1 %v2224_v37  ;;  %v3013_v21 = vpop.permute.xlu1 %1225 }
 0x294   : > { %v3017_v60 = vpop.permute.xlu1 %1235 }
 0x298   : > { %v3021_v24 = vpop.permute.xlu1 %1245 }
 0x2a1   : > { %1255 = vperm.xlu1 %2168, %v2991_v39  }
 0x2a3   : > { %1260 = vperm.xlu0 %2167, %v2994_v59  }
 0x2e1   : > { %v958_v7 = vpop.xlane.xlu1 %957 }
 0x2e2   : > { %v989_v8 = vadd.f32 %v958_v7, %v941_v36  ;;  %v952_v7 = vmul.f32 %v2948_v3, %v936_v55  ;;  %v940_v3 = vld [vmem:[#allocation3 + $0x78] sm:$0xff] }
 0x2e4   : > { %1006 = vst.msk [vmem:[#allocation3] sm:$0xff] %vm1005_vm2, %v989_v8  ;;  %v960_v11 = vpop.xlane.xlu0 %959  ;;  %v953_v8 = vmul.f32 %v2958_v6, %v937_v62 }
 0x2e5   : > { %v990_v56 = vadd.f32 %v960_v11, %v942_v10 }
 0x2e7   : > { %1007 = vst.msk [vmem:[#allocation3 + $0x8] sm:$0xff] %vm1005_vm2, %v990_v56  ;;  %v939_v56 = vld [vmem:[#allocation3 + $0x70] sm:$0xff] }
 0x2e8   : > { %v962_v13 = vpop.xlane.xlu0 %961 }
 0x2e9   : > { %v991_v53 = vadd.f32 %v962_v13, %v943_v12  ;;  %v954_v12 = vmul.f32 %v2954_v5, %v938_v1  ;;  %v955_v13 = vmul.f32 %v2991_v39, %v939_v56 }
 0x2eb   : > { %1008 = vst.msk [vmem:[#allocation3 + $0x10] sm:$0xff] %vm1005_vm2, %v991_v53 }
 0x2fd   : > { %v964_v25 = vpop.xlane.xlu1 %963 }
 0x2fe   : > { %v992_v26 = vadd.f32 %v964_v25, %v944_v17 }
 0x300   : > { %1009 = vst.msk [vmem:[#allocation3 + $0x18] sm:$0xff] %vm1005_vm2, %v992_v26  ;;  %v1173_v26 = vld [vmem:[#allocation4 + $0x8] sm:$0xff] }
 0x301   : > { %v966_v29 = vpop.xlane.xlu0 %965 }
 0x302   : > { %v993_v35 = vadd.f32 %v966_v29, %v945_v22  ;;  %v956_v22 = vmul.f32 %v2994_v59, %v940_v3  ;;  %v1167_v29 = vld [vmem:[#allocation4 + $0x30] sm:$0xff] }
 0x304   : > { %1010 = vst.msk [vmem:[#allocation3 + $0x20] sm:$0xff] %vm1005_vm2, %v993_v35  ;;  %v1264_v35 = vmul.f32 %v2997_v18, %v1168_v54 }
 0x305   : > { %v968_v58 = vpop.xlane.xlu1 %967 }
 0x306   : > { %v970_v28 = vpop.xlane.xlu0 %969  ;;  %v994_v14 = vadd.f32 %v968_v58, %v946_v34  ;;  %v1269_v34 = vmul.f32 %v3009_v23, %v1173_v26  ;;  %v1267_v26 = vmul.f32 %v3005_v9, %v1171_v15 }
 0x307   : > { %v995_v47 = vadd.f32 %v970_v28, %v947_v44  ;;  %v1263_v28 = vmul.f32 %v2999_v45, %v1167_v29 }
 0x308   : > { %1011 = vst.msk [vmem:[#allocation3 + $0x28] sm:$0xff] %vm1005_vm2, %v994_v14 }
 0x309   : > { %1012 = vst.msk [vmem:[#allocation3 + $0x30] sm:$0xff] %vm1005_vm2, %v995_v47  ;;  %v972_v49 = vpop.xlane.xlu1 %971  ;;  %v1176_v47 = vld [vmem:[#allocation4 + $0x20] sm:$0xff] }
 0x30a   : > { %v974_v43 = vpop.xlane.xlu0 %973  ;;  %v996_v37 = vadd.f32 %v972_v49, %v948_v63  ;;  %v1175_v63 = vld [vmem:[#allocation4 + $0x40] sm:$0xff]  ;;  %v1272_v18 = vmul.f32 %v3015_v50, %v1176_v47 }
 0x30b   : > { %v997_v0 = vadd.f32 %v974_v43, %v949_v16  ;;  %v1271_v16 = vmul.f32 %v3013_v21, %v1175_v63  ;;  %v1178_v43 = vld [vmem:[#allocation4 + $0x38] sm:$0xff]  ;;  %v1179_v21 = vld [vmem:[#allocation4 + $0x60] sm:$0xff] }
 0x30c   : > { %1013 = vst.msk [vmem:[#allocation3 + $0x38] sm:$0xff] %vm1005_vm2, %v996_v37  ;;  %v1177_v37 = vld [vmem:[#allocation4 + $0x10] sm:$0xff]  ;;  %v1274_v38 = vmul.f32 %v3019_v51, %v1178_v43 }
 0x30d   : > { %1014 = vst.msk [vmem:[#allocation3 + $0x40] sm:$0xff] %vm1005_vm2, %v997_v0  ;;  %v976_v42 = vpop.xlane.xlu1 %975  ;;  %v1170_v0 = vld [vmem:[#allocation4 + $0x18] sm:$0xff] }
 0x30e   : > { %v978_v30 = vpop.xlane.xlu0 %977  ;;  %v998_v36 = vadd.f32 %v976_v42, %v950_v46  ;;  %v1273_v42 = vmul.f32 %v3017_v60, %v1177_v37  ;;  %v1275_v60 = vmul.f32 %v3021_v24, %v1179_v21 }
 0x30f   : > { %v999_v2 = vadd.f32 %v978_v30, %v951_v41  ;;  %v1180_v41 = vld [vmem:[#allocation4 + $0x70] sm:$0xff]  ;;  %v1169_v30 = vld [vmem:[#allocation4 + $0x58] sm:$0xff] }
 0x310   : > { %1015 = vst.msk [vmem:[#allocation3 + $0x48] sm:$0xff] %vm1005_vm2, %v998_v36  ;;  %v1266_v36 = vmul.f32 %v3003_v32, %v1170_v0 }
 0x311   : > { %1016 = vst.msk [vmem:[#allocation3 + $0x50] sm:$0xff] %vm1005_vm2, %v999_v2  ;;  %v980_v10 = vpop.xlane.xlu1 %979  ;;  %v1276_v2 = vmul.f32 %v3023_v61, %v1180_v41 }
 0x312   : > { %v982_v11 = vpop.xlane.xlu0 %981  ;;  %v1000_v52 = vadd.f32 %v980_v10, %v952_v7  ;;  %v1182_v10 = vld [vmem:[#allocation4 + $0x28] sm:$0xff] }
 0x313   : > { %v1001_v4 = vadd.f32 %v982_v11, %v953_v8  ;;  %v1265_v8 = vmul.f32 %v3001_v20, %v1169_v30 }
 0x314   : > { %1017 = vst.msk [vmem:[#allocation3 + $0x58] sm:$0xff] %vm1005_vm2, %v1000_v52 }
 0x315   : > { %1018 = vst.msk [vmem:[#allocation3 + $0x60] sm:$0xff] %vm1005_vm2, %v1001_v4  ;;  %v984_v53 = vpop.xlane.xlu1 %983  ;;  %v1172_v4 = vld [vmem:[#allocation4 + $0x68] sm:$0xff] }
 0x316   : > { %v986_v17 = vpop.xlane.xlu0 %985  ;;  %v1002_v25 = vadd.f32 %v984_v53, %v954_v12  ;;  %v1181_v12 = vld [vmem:[#allocation4 + $0x78] sm:$0xff] }
 0x317   : > { %v1003_v6 = vadd.f32 %v986_v17, %v955_v13  ;;  %v1268_v17 = vmul.f32 %v3007_v19, %v1172_v4 }
 0x318   : > { %1019 = vst.msk [vmem:[#allocation3 + $0x68] sm:$0xff] %vm1005_vm2, %v1002_v25 }
 0x319   : > { %1020 = vst.msk [vmem:[#allocation3 + $0x70] sm:$0xff] %vm1005_vm2, %v1003_v6  ;;  %v988_v5 = vpop.xlane.xlu1 %987  ;;  %v1946_v39 = vpop.f32.mrf.mxu1 }
 0x31a   : > { %v1004_v31 = vadd.f32 %v988_v5, %v956_v22  ;;  %v1286_v44 = vadd.f32 %v1946_v39, %v1270_v27 }
 0x31b   : > { %v1118_v58 = vpop.f32.mrf.mxu1  ;;  %v1937_v48 = vpop.f32.mrf.mxu0 }
 0x31c   : > { %1021 = vst.msk [vmem:[#allocation3 + $0x78] sm:$0xff] %vm1005_vm2, %v1004_v31  ;;  %1302 = vst [vmem:[#allocation4 + $0x48] sm:$0xff] %v1286_v44  ;;  %v1285_v59 = vadd.f32 %v1269_v34, %v1118_v58  ;;  %v1280_v33 = vadd.f32 %v1937_v48, %v1264_v35 }
 0x31d   : > { %v1088_v14 = vpop.f32.mrf.mxu0  ;;  %v1256_v32 = vpop.permute.xlu1 %1255 }
 0x31e   : > { %1301 = vst [vmem:[#allocation4 + $0x8] sm:$0xff] %v1285_v59  ;;  %1296 = vst [vmem:[#allocation4] sm:$0xff] %v1280_v33  ;;  %v1279_v57 = vadd.f32 %v1263_v28, %v1088_v14  ;;  %v1261_v51 = vpop.permute.xlu0 %1260  ;;  %v1277_v25 = vmul.f32 %v1256_v32, %v1181_v12 }
 0x31f   : > { %v1278_v3 = vmul.f32 %v1261_v51, %v1182_v10 }
 0x320   : > { %1295 = vst [vmem:[#allocation4 + $0x30] sm:$0xff] %v1279_v57 }
 0x328   : > { %v1949_v23 = vpop.f32.mrf.mxu1 }
 0x329   : > { %v1288_v49 = vadd.f32 %v1949_v23, %v1272_v18 }
 0x32a   : > { %v1128_v40 = vpop.f32.mrf.mxu1 }
 0x32b   : > { %1304 = vst [vmem:[#allocation4 + $0x20] sm:$0xff] %v1288_v49  ;;  %v1287_v45 = vadd.f32 %v1271_v16, %v1128_v40 }
 0x32d   : > { %1303 = vst [vmem:[#allocation4 + $0x40] sm:$0xff] %v1287_v45 }
 0x331   : > { %v1952_v46 = vpop.f32.mrf.mxu1 }
 0x332   : > { %v1290_v55 = vadd.f32 %v1952_v46, %v1274_v38 }
 0x333   : > { %v1138_v50 = vpop.f32.mrf.mxu1 }
 0x334   : > { %1306 = vst [vmem:[#allocation4 + $0x38] sm:$0xff] %v1290_v55  ;;  %v1289_v62 = vadd.f32 %v1273_v42, %v1138_v50  ;;  %v1940_v7 = vpop.f32.mrf.mxu0 }
 0x335   : > { %v1282_v1 = vadd.f32 %v1940_v7, %v1266_v36  ;;  %v1955_v11 = vpop.f32.mrf.mxu1 }
 0x336   : > { %1305 = vst [vmem:[#allocation4 + $0x10] sm:$0xff] %v1289_v62  ;;  %v1292_v52 = vadd.f32 %v1955_v11, %v1276_v2  ;;  %v1098_v56 = vpop.f32.mrf.mxu0 }
 0x337   : > { %1298 = vst [vmem:[#allocation4 + $0x18] sm:$0xff] %v1282_v1  ;;  %v1281_v13 = vadd.f32 %v1265_v8, %v1098_v56  ;;  %v1148_v53 = vpop.f32.mrf.mxu1 }
 0x338   : > { %1308 = vst [vmem:[#allocation4 + $0x70] sm:$0xff] %v1292_v52  ;;  %v1291_v61 = vadd.f32 %v1275_v60, %v1148_v53 }
 0x339   : > { %1297 = vst [vmem:[#allocation4 + $0x58] sm:$0xff] %v1281_v13  ;;  %v1958_v20 = vpop.f32.mrf.mxu1 }
 0x33a   : > { %1307 = vst [vmem:[#allocation4 + $0x60] sm:$0xff] %v1291_v61  ;;  %v1294_v6 = vadd.f32 %v1958_v20, %v1278_v3 }
 0x33b   : > { %v1158_v24 = vpop.f32.mrf.mxu1 }
 0x33c   : > { %v1943_v54 = vpop.f32.mrf.mxu0  ;;  %1310 = vst [vmem:[#allocation4 + $0x28] sm:$0xff] %v1294_v6  ;;  %v1293_v22 = vadd.f32 %v1277_v25, %v1158_v24 }
 0x33d   : > { %v1284_v27 = vadd.f32 %v1943_v54, %v1268_v17  ;;  %1330 = sbr.rel (%p1752_p7) target bundleno = 1237 (0x4d5), region = 86 }
 0x33e   : > { %v1108_v5 = vpop.f32.mrf.mxu0  ;;  %1309 = vst [vmem:[#allocation4 + $0x78] sm:$0xff] %v1293_v22 }
 0x33f   : > { %1300 = vst [vmem:[#allocation4 + $0x68] sm:$0xff] %v1284_v27  ;;  %v1283_v29 = vadd.f32 %v1267_v26, %v1108_v5 }
 0x341   : > { %1299 = vst [vmem:[#allocation4 + $0x50] sm:$0xff] %v1283_v29 }
 0x342   : > { %v1346_v31 = vld [vmem:[#allocation3 + $0x78] sm:$0xff]  ;;  %v1344_v19 = vld [vmem:[#allocation3 + $0x68] sm:$0xff]  ;;  %v1345_v39 = vld [vmem:[#allocation3 + $0x70] sm:$0xff]  ;;  %v2413_v35 = vmov 0  }
 0x343   : > { %2234 = vset.pattern.permute.xlu1 %v2413_v35  ;;  %2233 = vset.pattern.permute.xlu0 %v2413_v35  ;;  %2235 = vrcp.f32 %v1346_v31  ;;  %v1343_v34 = vld [vmem:[#allocation3 + $0x60] sm:$0xff]  ;;  %v1342_v9 = vld [vmem:[#allocation3 + $0x58] sm:$0xff]  ;;  %v1341_v44 = vld [vmem:[#allocation3 + $0x50] sm:$0xff] }
 0x344   : > { %2237 = vrcp.f32 %v1344_v19  ;;  %v1340_v58 = vld [vmem:[#allocation3 + $0x48] sm:$0xff]  ;;  %v1339_v48 = vld [vmem:[#allocation3 + $0x40] sm:$0xff]  ;;  %v1338_v28 = vld [vmem:[#allocation3 + $0x38] sm:$0xff] }
 0x345   : > { %2239 = vrcp.f32 %v1345_v39  ;;  %v1337_v59 = vld [vmem:[#allocation3 + $0x30] sm:$0xff]  ;;  %v1336_v47 = vld [vmem:[#allocation3 + $0x28] sm:$0xff]  ;;  %v1335_v18 = vld [vmem:[#allocation3 + $0x20] sm:$0xff] }
 0x346   : > { %2241 = vrcp.f32 %v1343_v34  ;;  %v1334_v16 = vld [vmem:[#allocation3 + $0x18] sm:$0xff]  ;;  %v1333_v40 = vld [vmem:[#allocation3 + $0x10] sm:$0xff]  ;;  %v1332_v45 = vld [vmem:[#allocation3 + $0x8] sm:$0xff] }
 0x347   : > { %2243 = vrcp.f32 %v1342_v9  ;;  %v1331_v38 = vld [vmem:[#allocation3] sm:$0xff]  ;;  %v1509_v62 = vld [vmem:[%s3158_s2 + $0x10] sm:$0xff]  ;;  %v1378_v2 = vld [vmem:[#allocation4 + $0x28] sm:$0xff] }
 0x348   : > { %2245 = vrcp.f32 %v1341_v44  ;;  %v1507_v21 = vld [vmem:[%s3158_s2] sm:$0xff]  ;;  %1994 = vmatprep.mubr.f32.mxu1 %v1509_v62  ;;  %v1490_v7 = vld [vmem:[#allocation6 + $0x78] sm:$0xff]  ;;  %v1376_v10 = vld [vmem:[#allocation4 + $0x70] sm:$0xff] }
 0x349   : > { %2247 = vrcp.f32 %v1340_v58  ;;  %1991 = vmatprep.mubr.f32.mxu0 %v1507_v21  ;;  %v1377_v11 = vld [vmem:[#allocation4 + $0x78] sm:$0xff]  ;;  %v1488_v56 = vld [vmem:[#allocation6 + $0x68] sm:$0xff]  ;;  %v1489_v4 = vld [vmem:[#allocation6 + $0x70] sm:$0xff] }
 0x34a   : > { %2249 = vrcp.f32 %v1339_v48  ;;  %v1375_v13 = vld [vmem:[#allocation4 + $0x60] sm:$0xff]  ;;  %v1374_v17 = vld [vmem:[#allocation4 + $0x38] sm:$0xff]  ;;  %v1373_v26 = vld [vmem:[#allocation4 + $0x10] sm:$0xff] }
 0x34b   : > { %2251 = vrcp.f32 %v1338_v28  ;;  %v1487_v20 = vld [vmem:[#allocation6 + $0x60] sm:$0xff]  ;;  %v1486_v54 = vld [vmem:[#allocation6 + $0x58] sm:$0xff]  ;;  %v1485_v29 = vld [vmem:[#allocation6 + $0x50] sm:$0xff] }
 0x34c   : > { %2253 = vrcp.f32 %v1337_v59  ;;  %v1372_v31 = vld [vmem:[#allocation4 + $0x20] sm:$0xff]  ;;  %v1484_v34 = vld [vmem:[#allocation6 + $0x48] sm:$0xff]  ;;  %v1478_v62 = vld [vmem:[#allocation6 + $0x18] sm:$0xff] }
 0x34d   : > { %2255 = vrcp.f32 %v1336_v47  ;;  %v1371_v9 = vld [vmem:[#allocation4 + $0x40] sm:$0xff]  ;;  %v1370_v59 = vld [vmem:[#allocation4 + $0x48] sm:$0xff]  ;;  %v1482_v47 = vld [vmem:[#allocation6 + $0x38] sm:$0xff] }
 0x34e   : > { %2257 = vrcp.f32 %v1335_v18  ;;  %v1483_v28 = vld [vmem:[#allocation6 + $0x40] sm:$0xff] }
 0x34f   : > { %2259 = vrcp.f32 %v1334_v16 }
 0x350   : > { %v2236_v33 = vpop.eup %2235  ;;  %2261 = vrcp.f32 %v1333_v40  ;;  %v1368_v40 = vld [vmem:[#allocation4 + $0x68] sm:$0xff] }
 0x351   : > { %v2238_v14 = vpop.eup %2237  ;;  %1456 = vperm.xlu0 %2233, %v2236_v33   ;;  %2263 = vrcp.f32 %v1332_v45 }
 0x352   : > { %v2240_v57 = vpop.eup %2239  ;;  %1446 = vperm.xlu1 %2234, %v2238_v14   ;;  %2265 = vrcp.f32 %v1331_v38  ;;  %v1480_v38 = vld [vmem:[#allocation6 + $0x28] sm:$0xff] }
 0x353   : > { %v2242_v63 = vpop.eup %2241 }
 0x354   : > { %v2244_v23 = vpop.eup %2243 }
 0x355   : > { %1451 = vperm.xlu0 %2233, %v2240_v57   ;;  %v2246_v49 = vpop.eup %2245 }
 0x356   : > { %1441 = vperm.xlu1 %2234, %v2242_v63   ;;  %v2248_v43 = vpop.eup %2247  ;;  %v1369_v63 = vld [vmem:[#allocation4 + $0x8] sm:$0xff] }
 0x357   : > { %v2250_v37 = vpop.eup %2249 }
 0x358   : > { %v2252_v0 = vpop.eup %2251 }
 0x359   : > { %1436 = vperm.xlu0 %2233, %v2244_v23   ;;  %v2254_v46 = vpop.eup %2253 }
 0x35a   : > { %1431 = vperm.xlu1 %2234, %v2246_v49   ;;  %v2256_v41 = vpop.eup %2255  ;;  %v1481_v49 = vld [vmem:[#allocation6 + $0x30] sm:$0xff] }
 0x35b   : > { %v2258_v42 = vpop.eup %2257 }
 0x35c   : > { %v2260_v55 = vpop.eup %2259 }
 0x35d   : > { %1426 = vperm.xlu0 %2233, %v2248_v43   ;;  %v2262_v30 = vpop.eup %2261 }
 0x35e   : > { %1421 = vperm.xlu1 %2234, %v2250_v37   ;;  %v2264_v50 = vpop.eup %2263 }
 0x35f   : > { %v2266_v36 = vpop.eup %2265 }
 0x361   : > { %1416 = vperm.xlu0 %2233, %v2252_v0   ;;  %v1367_v0 = vld [vmem:[#allocation4 + $0x50] sm:$0xff] }
 0x362   : > { %1411 = vperm.xlu1 %2234, %v2254_v46  }
 0x365   : > { %1406 = vperm.xlu0 %2233, %v2256_v41  }
 0x366   : > { %1401 = vperm.xlu1 %2234, %v2258_v42  }
 0x369   : > { %1396 = vperm.xlu0 %2233, %v2260_v55   ;;  %v1479_v55 = vld [vmem:[#allocation6 + $0x20] sm:$0xff] }
 0x36a   : > { %1391 = vperm.xlu1 %2234, %v2262_v30   ;;  %v1366_v30 = vld [vmem:[#allocation4 + $0x18] sm:$0xff] }
 0x36d   : > { %1386 = vperm.xlu0 %2233, %v2264_v50  }
 0x36e   : > { %1381 = vperm.xlu1 %2234, %v2266_v36  }
 0x3cc   : > { %v1457_v8 = vpop.permute.xlu0 %1456 }
 0x3cd   : > { %v1474_v51 = vmul.f32 %v1457_v8, %v1378_v2  ;;  %v1447_v1 = vpop.permute.xlu1 %1446  ;;  %v1365_v2 = vld [vmem:[#allocation4 + $0x58] sm:$0xff] }
 0x3ce   : > { %v1472_v52 = vmul.f32 %v1447_v1, %v1376_v10  ;;  %v1364_v1 = vld [vmem:[#allocation4] sm:$0xff] }
 0x3cf   : > { %v1506_v60 = vmul.f32 %v1490_v7, %v1474_v51  ;;  %v1477_v51 = vld [vmem:[#allocation6 + $0x10] sm:$0xff] }
 0x3d0   : > { %v1452_v12 = vpop.permute.xlu0 %1451  ;;  %v1504_v53 = vmul.f32 %v1488_v56, %v1472_v52  ;;  %v1476_v56 = vld [vmem:[#allocation6 + $0x8] sm:$0xff] }
 0x3d1   : > { %v1473_v32 = vmul.f32 %v1452_v12, %v1377_v11  ;;  %1959 = vmatprep.subr.mxu0 %v1506_v60  ;;  %2029 = vmatprep.subr.mxu1 %v1506_v60  ;;  %v1442_v61 = vpop.permute.xlu1 %1441 }
 0x3d2   : > { %1960 = vmatpush3.xpose.msra.mxu0 %v1506_v60  ;;  %2045 = vmatpush3.xpose.msra.mxu1 %v1506_v60  ;;  %v1471_v15 = vmul.f32 %v1442_v61, %v1375_v13  ;;  %v1508_v61 = vld [vmem:[%s3158_s2 + $0x8] sm:$0xff] }
 0x3d3   : > { %v1505_v3 = vmul.f32 %v1489_v4, %v1473_v32  ;;  %v1363_v4 = vld [vmem:[#allocation4 + $0x30] sm:$0xff] }
 0x3d4   : > { %v1437_v25 = vpop.permute.xlu0 %1436  ;;  %v1503_v6 = vmul.f32 %v1487_v20, %v1471_v15  ;;  %v1510_v15 = vld [vmem:[%s3158_s2 + $0x18] sm:$0xff] }
 0x3d5   : > { %1961 = vmatprep.subr.mxu0 %v1505_v3  ;;  %2030 = vmatprep.subr.mxu1 %v1505_v3  ;;  %v1470_v24 = vmul.f32 %v1437_v25, %v1374_v17  ;;  %v1432_v22 = vpop.permute.xlu1 %1431 }
 0x3d6   : > { %1962 = vmatpush3.xpose.msra.mxu0 %v1505_v3  ;;  %2046 = vmatpush3.xpose.msra.mxu1 %v1505_v3  ;;  %v1469_v5 = vmul.f32 %v1432_v22, %v1373_v26 }
 0x3d7   : > { %1963 = vmatprep.subr.mxu0 %v1504_v53  ;;  %2031 = vmatprep.subr.mxu1 %v1504_v53  ;;  %v1502_v27 = vmul.f32 %v1486_v54, %v1470_v24 }
 0x3d8   : > { %v1427_v19 = vpop.permute.xlu0 %1426  ;;  %v1501_v39 = vmul.f32 %v1485_v29, %v1469_v5 }
 0x3d9   : > { %v1468_v35 = vmul.f32 %v1427_v19, %v1372_v31  ;;  %v1422_v44 = vpop.permute.xlu1 %1421 }
 0x3da   : > { %1964 = vmatpush3.xpose.msra.mxu0 %v1504_v53  ;;  %2047 = vmatpush3.xpose.msra.mxu1 %v1504_v53  ;;  %v1467_v48 = vmul.f32 %v1422_v44, %v1371_v9  ;;  %v1475_v53 = vld [vmem:[#allocation6] sm:$0xff] }
 0x3db   : > { %1965 = vmatprep.subr.mxu0 %v1503_v6  ;;  %2032 = vmatprep.subr.mxu1 %v1503_v6  ;;  %v1500_v58 = vmul.f32 %v1484_v34, %v1468_v35 }
 0x3dc   : > { %v1417_v33 = vpop.permute.xlu0 %1416  ;;  %v1499_v14 = vmul.f32 %v1483_v28, %v1467_v48 }
 0x3dd   : > { %v1466_v57 = vmul.f32 %v1417_v33, %v1370_v59  ;;  %v1412_v18 = vpop.permute.xlu1 %1411 }
 0x3de   : > { %1966 = vmatpush3.xpose.msra.mxu0 %v1503_v6  ;;  %2048 = vmatpush3.xpose.msra.mxu1 %v1503_v6  ;;  %v1465_v16 = vmul.f32 %v1412_v18, %v1369_v63 }
 0x3df   : > { %1967 = vmatprep.subr.mxu0 %v1502_v27  ;;  %2033 = vmatprep.subr.mxu1 %v1502_v27  ;;  %v1498_v23 = vmul.f32 %v1482_v47, %v1466_v57 }
 0x3e0   : > { %v1407_v43 = vpop.permute.xlu0 %1406  ;;  %v1497_v45 = vmul.f32 %v1481_v49, %v1465_v16 }
 0x3e1   : > { %v1464_v37 = vmul.f32 %v1407_v43, %v1368_v40  ;;  %v1402_v46 = vpop.permute.xlu1 %1401 }
 0x3e2   : > { %1968 = vmatpush3.xpose.msra.mxu0 %v1502_v27  ;;  %2049 = vmatpush3.xpose.msra.mxu1 %v1502_v27  ;;  %v1463_v42 = vmul.f32 %v1402_v46, %v1367_v0 }
 0x3e3   : > { %1969 = vmatprep.subr.mxu0 %v1501_v39  ;;  %2034 = vmatprep.subr.mxu1 %v1501_v39  ;;  %v1496_v41 = vmul.f32 %v1480_v38, %v1464_v37 }
 0x3e4   : > { %v1397_v50 = vpop.permute.xlu0 %1396  ;;  %v1495_v36 = vmul.f32 %v1479_v55, %v1463_v42 }
 0x3e5   : > { %v1462_v21 = vmul.f32 %v1397_v50, %v1366_v30  ;;  %v1392_v7 = vpop.permute.xlu1 %1391 }
 0x3e6   : > { %1970 = vmatpush3.xpose.msra.mxu0 %v1501_v39  ;;  %2050 = vmatpush3.xpose.msra.mxu1 %v1501_v39  ;;  %v1461_v10 = vmul.f32 %v1392_v7, %v1365_v2 }
 0x3e7   : > { %1971 = vmatprep.subr.mxu0 %v1500_v58  ;;  %2035 = vmatprep.subr.mxu1 %v1500_v58  ;;  %v1494_v8 = vmul.f32 %v1478_v62, %v1462_v21 }
 0x3e8   : > { %v1387_v11 = vpop.permute.xlu0 %1386  ;;  %v1493_v60 = vmul.f32 %v1477_v51, %v1461_v10 }
 0x3e9   : > { %v1460_v52 = vmul.f32 %v1387_v11, %v1364_v1  ;;  %v1382_v12 = vpop.permute.xlu1 %1381 }
 0x3ea   : > { %1972 = vmatpush3.xpose.msra.mxu0 %v1500_v58  ;;  %2051 = vmatpush3.xpose.msra.mxu1 %v1500_v58  ;;  %v1459_v13 = vmul.f32 %v1382_v12, %v1363_v4 }
 0x3eb   : > { %1973 = vmatprep.subr.mxu0 %v1499_v14  ;;  %2036 = vmatprep.subr.mxu1 %v1499_v14  ;;  %v1492_v32 = vmul.f32 %v1476_v56, %v1460_v52 }
 0x3ec   : > { %v1491_v3 = vmul.f32 %v1475_v53, %v1459_v13 }
 0x3ee   : > { %1974 = vmatpush3.xpose.msra.mxu0 %v1499_v14  ;;  %2052 = vmatpush3.xpose.msra.mxu1 %v1499_v14 }
 0x3ef   : > { %1975 = vmatprep.subr.mxu0 %v1498_v23  ;;  %2037 = vmatprep.subr.mxu1 %v1498_v23 }
 0x3f2   : > { %1976 = vmatpush3.xpose.msra.mxu0 %v1498_v23  ;;  %2053 = vmatpush3.xpose.msra.mxu1 %v1498_v23 }
 0x3f3   : > { %1977 = vmatprep.subr.mxu0 %v1497_v45  ;;  %2038 = vmatprep.subr.mxu1 %v1497_v45 }
 0x3f6   : > { %1978 = vmatpush3.xpose.msra.mxu0 %v1497_v45  ;;  %2054 = vmatpush3.xpose.msra.mxu1 %v1497_v45 }
 0x3f7   : > { %1979 = vmatprep.subr.mxu0 %v1496_v41  ;;  %2039 = vmatprep.subr.mxu1 %v1496_v41 }
 0x3fa   : > { %1980 = vmatpush3.xpose.msra.mxu0 %v1496_v41  ;;  %2055 = vmatpush3.xpose.msra.mxu1 %v1496_v41 }
 0x3fb   : > { %1981 = vmatprep.subr.mxu0 %v1495_v36  ;;  %2040 = vmatprep.subr.mxu1 %v1495_v36 }
 0x3fe   : > { %1982 = vmatpush3.xpose.msra.mxu0 %v1495_v36  ;;  %2056 = vmatpush3.xpose.msra.mxu1 %v1495_v36 }
 0x3ff   : > { %1983 = vmatprep.subr.mxu0 %v1494_v8  ;;  %2041 = vmatprep.subr.mxu1 %v1494_v8 }
 0x402   : > { %1984 = vmatpush3.xpose.msra.mxu0 %v1494_v8  ;;  %2057 = vmatpush3.xpose.msra.mxu1 %v1494_v8 }
 0x403   : > { %1985 = vmatprep.subr.mxu0 %v1493_v60  ;;  %2042 = vmatprep.subr.mxu1 %v1493_v60 }
 0x406   : > { %1986 = vmatpush3.xpose.msra.mxu0 %v1493_v60  ;;  %2058 = vmatpush3.xpose.msra.mxu1 %v1493_v60 }
 0x407   : > { %1987 = vmatprep.subr.mxu0 %v1492_v32  ;;  %2043 = vmatprep.subr.mxu1 %v1492_v32 }
 0x40a   : > { %1988 = vmatpush3.xpose.msra.mxu0 %v1492_v32  ;;  %2059 = vmatpush3.xpose.msra.mxu1 %v1492_v32 }
 0x40b   : > { %1989 = vmatprep.subr.mxu0 %v1491_v3  ;;  %2044 = vmatprep.subr.mxu1 %v1491_v3 }
 0x40e   : > { %1990 = vmatpush3.xpose.msra.mxu0 %v1491_v3  ;;  %2060 = vmatpush3.xpose.msra.mxu1 %v1491_v3 }
 0x411   : > { %1992 = vmatmul.mubr.f32.vlgmr.msra.gmra.mxu0 %v1508_v61  ;;  %1995 = vmatmul.mubr.f32.vlgmr.msra.gmra.mxu1 %v1510_v15 }
 0x4d1   : > { %v1993_v20 = vpop.f32.mrf.mxu0  ;;  %v1996_v17 = vpop.f32.mrf.mxu1 }
 0x4d2   : > { %1597 = vst [vmem:[%s2570_s11 + $0x8] sm:$0xff] %v1993_v20  ;;  %1599 = vst [vmem:[%s2570_s11 + $0x18] sm:$0xff] %v1996_v17 }
 0x4d3   : > { %v1577_v25 = vpop.f32.mrf.mxu0  ;;  %v1587_v6 = vpop.f32.mrf.mxu1 }
 0x4d4   : > { %1596 = vst [vmem:[%s2570_s11] sm:$0xff] %v1577_v25  ;;  %1598 = vst [vmem:[%s2570_s11 + $0x10] sm:$0xff] %v1587_v6 }
 0x4d5 PF: > { %s1758_s27 = sshll.u32 %s2393_s21, 9  ;;  %s1614_s18 = sshll.u32 %s2570_s11, 4  ;;  %s3095_s18 = int_to_ptr.vmem [resolvable:$true] %s1614_s18 }
 0x4d6   : > { %s3092_s10 = scalar_lea.hbm %s3160_s4, %s1758_s27  ;;  %s3099_s12 = scalar_lea.sflag [#allocation8], %s271_s28 }
 0x4d7   : > { %s2293_s13 = scalar_lea.vmem %s3095_s18, 512  ;;  %p3177_p1 = scmp.ne.s32.totalorder %s3170_s7, 0 }
 0x4d8   : > { %p2294_p12 = scmp.ne.s32.totalorder %s3095_s18, %s2293_s13  ;;  %s2414_s21 = smov [#allocation9]  }
 0x4d9   : > { %s2297_s14 = sshll.u32 %s2414_s21, 4  ;;  %s2298_s14 = int_to_ptr.vmem [resolvable:$false] %s2297_s14 }
 0x4da   : > { %p2295_p2 = pnand %p2294_p12, %p3177_p1  ;;  %s2299_s20 = scalar_lea.vmem %s2298_s14, 1024 }
 0x4db   : > { %p2300_p5 = scmp.lt.s32.totalorder %s3095_s18, %s2298_s14  ;;  %p2301_p6 = scmp.lt.s32.totalorder %s2299_s20, %s2293_s13 }
 0x4dc   : > { %p2296_p4 = pneg %p2295_p2 }
 0x4dd   : > { %p2302_p8 = por %p2301_p6, %p2300_p5 }
 0x4df   : > { %p2303_p9 = pnand %p2302_p8, %p2296_p4 }
 0x4e1   : > { %2306 = shalt.err (!%p2303_p9)
}
 0x4e2   : > { %s2307_s28 = scalar_lea.hbm %s3092_s10, 512  ;;  %s2311_s6 = scalar_lea.hbm %s3160_s4, 1024 }
 0x4e3   : > { %p2308_p10 = scmp.ne.s32.totalorder %s3092_s10, %s2307_s28  ;;  %p2312_p0 = scmp.lt.s32.totalorder %s3092_s10, %s3160_s4 }
 0x4e4   : > { %p2313_p3 = scmp.lt.s32.totalorder %s2311_s6, %s2307_s28 }
 0x4e5   : > { %p2309_p11 = pnand %p2308_p10, %p3177_p1 }
 0x4e6   : > { %p2314_p7 = por %p2313_p3, %p2312_p0 }
 0x4e7   : > { %p2310_p13 = pneg %p2309_p11 }
 0x4e9   : > { %p2315_p12 = pnand %p2314_p7, %p2310_p13 }
 0x4eb   : > { %2318 = shalt.err (!%p2315_p12)
}
 0x4ec   : > { %s2415_s26 = smov 128   ;;  %s2416_s29 = smov 8  }
 0x4ed   : > { %2065 = dma.vmem_to_hbm [thread:$0]  (%p3177_p1), %s3095_s18, 512, %s3092_s10, %s3099_s12, %s2415_s26, %s2415_s26, %s2416_s29  }
 0x4ee PF: > { %s3178_s30 = sld [smem:[#allocation15_spill]]  ;;  %p2077_p2 = scmp.ge.s32.totalorder %s2405_s24, 2 }
 0x4ef   : > { %s1629_s27 = sand.u32 1, %s2369_s15  }
 0x4f0   : > { %s1630_s5 = scalar_lea.sflag [#allocation8], %s1629_s27 }
 0x4f4   : > { %p3179_p4 = scmp.ne.s32.totalorder %s3178_s30, 0 }
 0x4f6   : > { %p2072_p5 = pnand %p2077_p2, %p3179_p4 }
 0x4f8   : > { %p2073_p6 = pneg %p2072_p5 }
 0x4fa   : > { %2364 = dma.done.wait (%p2073_p6), %s1630_s5, 512  }
 0x4fb   : > { %2366 = vsyncadd (%p2073_p6), %s1630_s5, 4294966784  ;;  %s18_s24 = sadd.s32 1, %s2405_s24   ;;  %s3180_s17 = sld [smem:[#allocation12_spill]] }
 0x4fc   : > { %p15_p8 = scmp.ge.s32.totalorder %s18_s24, 10   ;;  %s3181_s13 = sld [smem:[#allocation16_spill]] }
 0x4fd   : > { %s3182_s7 = sld [smem:[#allocation17_spill]]  ;;  %s3185_s15 = smov %s2373_s16 }
 0x4fe   : > { %s3183_s10 = sld [smem:[#allocation13_spill]]  ;;  %s3188_s18 = smov %s2385_s19 }
 0x4ff   : > { %s3184_s12 = sld [smem:[#allocation14_spill]]  ;;  %s3190_s20 = smov %s2397_s22 }
 0x500   : > { %s3191_s21 = smov %s2401_s23 }
 0x501   : > { %s3186_s16 = smov %s3180_s17  ;;  %17 = sbr.rel (!%p15_p8) target bundleno = 7 (0x7), region = 127 }
 0x502   : > { %s3187_s17 = smov %s3181_s13 }
 0x503   : > { %s3189_s19 = smov %s3182_s7 }
 0x504   : > { %s3192_s22 = smov %s3183_s10 }
 0x505   : > { %s3193_s23 = smov %s3184_s12 }
 0x506   :  { %1635 = vsyncpa [#allocation7], 1 }
 0x507   :  { %1637 = vsyncpa [#allocation7 + $0x1], 1 }
 0x508   :  { %1638 = vsyncpa [#allocation8], 1 }
 0x509   :  { %1640 = vsyncpa [#allocation8 + $0x1], 1 }

</bundles_post_ra>
